<compile_context>
chip_gen: v7x
topology: tpu7x:2x2x1
jax: 0.10.0
libtpu: 0.0.40
codegen_flags: <defaults>
</compile_context>

<pallas_src>
import functools

import numpy as np
import jax
import jax.numpy as jnp
from jax import lax
from jax.experimental import pallas as pl
from jax.experimental.pallas import tpu as pltpu

NUM_CLASSES = 80
REG_MAX = 16
HYP = {'box': 7.5, 'cls': 0.5, 'dfl': 1.5}
T_PAD = 16          # static padded number of matched targets per FPN level


# --------------------------------------------------------------------------
# Pallas kernel: all FPN levels in one invocation (masked per-level means).
# Layout: matched targets on sublanes, reg_max bins / classes on lanes.
# --------------------------------------------------------------------------
def _yolo_loss_kernel(gath_ref, geom_ref, out_ref, *, reg_max, num_classes,
                      box_w, cls_w, dfl_w):
    R = reg_max
    C = num_classes
    num_levels = gath_ref.shape[0]
    T = gath_ref.shape[1]

    iota_r = lax.broadcasted_iota(jnp.int32, (T, R), 1).astype(jnp.float32)
    iota_c = lax.broadcasted_iota(jnp.int32, (T, C), 1).astype(jnp.float32)

    lb = jnp.float32(0.0)
    lc = jnp.float32(0.0)
    ld = jnp.float32(0.0)

    for lvl in range(num_levels):
        gl = gath_ref[lvl]                    # [T, 2R + C] gathered logits
        pb_l = gl[:, :R]                      # left DFL bins
        pb_r = gl[:, R:2 * R]                 # right DFL bins
        pc = gl[:, 2 * R:]                    # class logits

        ge = geom_ref[lvl]                    # [T, 8] packed per-target geometry
        grid_x = ge[:, 0:1]
        gt_x1 = ge[:, 1:2]
        gt_x2 = ge[:, 2:3]
        gt_cls = ge[:, 3:4]
        mask = ge[:, 4:5]
        nval = jnp.sum(mask)
        denom = jnp.maximum(nval, 1.0)        # zero-match level contributes 0

        # ---- classification: BCE-with-logits vs label-smoothed one-hot -----
        one_hot = jnp.where(iota_c == gt_cls, 1.0, 0.0)
        z = one_hot * (1.0 - 0.1) + 0.1 / C
        bce = (jnp.maximum(pc, 0.0) - pc * z
               + jnp.log(1.0 + jnp.exp(-jnp.abs(pc))))
        lc = lc + jnp.sum(bce * mask) / (denom * C)

        # ---- shared softmax statistics per DFL half -------------------------
        # max/exp/sum computed ONCE, reused for the decode expectation and the
        # soft-CE log-softmax (halves the EUP/XLU work of the DFL section).
        def stats(p):
            m = jnp.max(p, axis=1, keepdims=True)
            e = jnp.exp(p - m)
            s = jnp.sum(e, axis=1, keepdims=True)
            d = jnp.sum(e * iota_r, axis=1, keepdims=True) / s   # expectation
            lse = m + jnp.log(s)                                  # logsumexp
            return d, lse

        d_l, lse_l = stats(pb_l)
        d_r, lse_r = stats(pb_r)

        # ---- box: 1D IoU on DFL-decoded boxes -------------------------------
        pred_x1 = grid_x - d_l
        pred_x2 = grid_x + d_r
        inter = jnp.maximum(jnp.minimum(pred_x2, gt_x2)
                            - jnp.maximum(pred_x1, gt_x1), 0.0)
        union = (pred_x2 - pred_x1) + (gt_x2 - gt_x1) - inter
        iou = inter / (union + 1e-7)
        lb = lb + jnp.sum((1.0 - iou) * mask) / denom

        # ---- DFL: soft-label CE against two-bin encoded targets -------------
        # encoded target sums to 1, so CE = lse - sum(target * logits).
        def encode(c):
            c = jnp.clip(c, 0.0, R - 1.01)
            f = jnp.floor(c)
            return (jnp.where(iota_r == f, (f + 1.0) - c, 0.0)
                    + jnp.where(iota_r == (f + 1.0), c - f, 0.0))

        ce_l = lse_l - jnp.sum(encode(grid_x - gt_x1) * pb_l,
                               axis=1, keepdims=True)
        ce_r = lse_r - jnp.sum(encode(gt_x2 - grid_x) * pb_r,
                               axis=1, keepdims=True)
        ld = ld + jnp.sum((ce_l + ce_r) * mask) / denom

    out_ref[0] = lb
    out_ref[1] = lc
    out_ref[2] = ld
    out_ref[3] = lb * box_w + lc * cls_w + ld * dfl_w


@functools.partial(
    jax.jit,
    static_argnames=("reg_max", "num_classes", "box_w", "cls_w", "dfl_w"))
def _device_loss(preds, b_idx, g_idx, geom, *, reg_max, num_classes,
                 box_w, cls_w, dfl_w):
    """Single jitted hot path: native-layout gather + fused Pallas loss."""
    # Gather the <=T_PAD matched anchors straight from the NCL layout
    # (take along L) -- no [B, L, C] transpose is ever materialized.
    gathered = jnp.stack(
        [p[b_idx[i], :, g_idx[i]].astype(jnp.float32)
         for i, p in enumerate(preds)], axis=0)   # [levels, T_PAD, 2R+C]

    kernel = functools.partial(
        _yolo_loss_kernel, reg_max=reg_max, num_classes=num_classes,
        box_w=box_w, cls_w=cls_w, dfl_w=dfl_w)
    return pl.pallas_call(
        kernel,
        out_shape=jax.ShapeDtypeStruct((4,), jnp.float32),
        in_specs=[pl.BlockSpec(memory_space=pltpu.MemorySpace.VMEM),
                  pl.BlockSpec(memory_space=pltpu.MemorySpace.VMEM)],
        out_specs=pl.BlockSpec(memory_space=pltpu.MemorySpace.SMEM),
    )(gathered, geom)


# --------------------------------------------------------------------------
# Host glue: build_targets (mirrors the reference) and static padding.
# --------------------------------------------------------------------------
def build_targets_host(pred_lengths, targets_np):
    # TODO(synk): build_targets is inherently host-side Python (data-dependent
    # per-target matching + dedup), exactly like the reference module.
    out = []
    for l in pred_lengths:
        matched = []
        for t in targets_np:
            b_idx, cls_id, cx, w = (float(t[0]), float(t[1]),
                                    float(t[2]), float(t[3]))
            grid_x = int(cx * l)
            for off in (-1, 0, 1):
                g = grid_x + off
                if 0 <= g < l and w > 0:
                    matched.append((b_idx, float(g), cls_id, cx, w))
        # dedup like set(map(tuple, ...)); sorted only for determinism (losses
        # are per-level means, hence order-invariant).
        out.append(sorted(set(matched)))
    return out


def yolo1d_loss(preds, targets_np, num_classes=NUM_CLASSES, reg_max=REG_MAX,
                hyp=None):
    hyp_all = dict(HYP)
    if hyp:
        hyp_all.update(hyp)

    num_levels = len(preds)
    lengths = [int(p.shape[2]) for p in preds]
    c_tot = 2 * reg_max + num_classes
    for p in preds:
        assert int(p.shape[1]) == c_tot

    if targets_np.shape[0] == 0:
        return jnp.float32(0.0), jnp.zeros((4,), jnp.float32)

    targets_out = build_targets_host(lengths, targets_np)

    # Static-shape padded index / geometry slabs (padded slots gather row
    # (batch 0, grid 0) and are masked out inside the kernel).
    b_idx = np.zeros((num_levels, T_PAD), np.int32)
    g_idx = np.zeros((num_levels, T_PAD), np.int32)
    geom = np.zeros((num_levels, T_PAD, 8), np.float32)
    empty_levels = []
    for i, matched in enumerate(targets_out):
        n = len(matched)
        if n == 0:
            empty_levels.append(i)
            continue
        assert n <= T_PAD, f"T_PAD={T_PAD} too small for {n} matches"
        arr = np.asarray(matched, dtype=np.float64)   # [n, 5]: b, g, cls, cx, w
        l = lengths[i]
        cx_f = arr[:, 3] * l
        w_f = arr[:, 4] * l
        b_idx[i, :n] = arr[:, 0].astype(np.int32)
        g_idx[i, :n] = arr[:, 1].astype(np.int32)
        geom[i, :n, 0] = arr[:, 1]                    # grid_x
        geom[i, :n, 1] = cx_f - w_f / 2.0             # gt_x1 (feature units)
        geom[i, :n, 2] = cx_f + w_f / 2.0             # gt_x2
        geom[i, :n, 3] = arr[:, 2]                    # class id
        geom[i, :n, 4] = 1.0                          # valid mask

    items = _device_loss(
        tuple(preds), jnp.asarray(b_idx), jnp.asarray(g_idx),
        jnp.asarray(geom), reg_max=reg_max, num_classes=num_classes,
        box_w=float(hyp_all['box']), cls_w=float(hyp_all['cls']),
        dfl_w=float(hyp_all['dfl']))

    if empty_levels:
        # Cold path (rare): the reference adds CE against class 0 over every
        # anchor of a level with zero matches; done with plain jnp outside the
        # kernel so the hot path stays a single fused call.
        lb, lc, ld = items[0], items[1], items[2]
        for i in empty_levels:
            pc = preds[i][:, 2 * reg_max:, :]                     # [B, C, L]
            m = jnp.max(pc, axis=1, keepdims=True)
            lse = m[:, 0, :] + jnp.log(jnp.sum(jnp.exp(pc - m), axis=1))
            lc = lc + jnp.mean(lse - pc[:, 0, :])
        total = (lb * hyp_all['box'] + lc * hyp_all['cls']
                 + ld * hyp_all['dfl'])
        return total, jnp.stack([lb, lc, ld, total])

    return items[3], items


# --------------------------------------------------------------------------
# Pure numpy reference (same math as the PyTorch module) for verification.
# --------------------------------------------------------------------------
def _ref_loss(preds_np, targets_np, num_classes=NUM_CLASSES, reg_max=REG_MAX,
              hyp=HYP):
    lengths = [p.shape[2] for p in preds_np]
    targets_out = build_targets_host(lengths, targets_np)
    lb = lc = ld = 0.0
    r = np.arange(reg_max, dtype=np.float64)
    for i, pred in enumerate(preds_np):
        _, _, l = pred.shape
        matched = targets_out[i]
        if not matched:
            continue
        n = len(matched)
        b_idx = np.array([m[0] for m in matched], dtype=np.int64)
        g_idx = np.array([m[1] for m in matched], dtype=np.float64)
        cls_id = np.array([m[2] for m in matched], dtype=np.int64)
        cx = np.array([m[3] for m in matched], dtype=np.float64)
        w = np.array([m[4] for m in matched], dtype=np.float64)
        p = np.transpose(pred, (0, 2, 1)).astype(np.float64)
        gath = p[b_idx, g_idx.astype(np.int64)]
        pb, pc = gath[:, :2 * reg_max], gath[:, 2 * reg_max:]
        oh = np.eye(num_classes)[cls_id] * 0.9 + 0.1 / num_classes
        bce = np.maximum(pc, 0) - pc * oh + np.log1p(np.exp(-np.abs(pc)))
        lc += bce.mean()
        e = np.exp(pb.reshape(-1, reg_max)
                   - pb.reshape(-1, reg_max).max(1, keepdims=True))
        d = ((e / e.sum(1, keepdims=True)) @ r).reshape(-1, 2)
        x1, x2 = cx * l - w * l / 2, cx * l + w * l / 2
        px1, px2 = g_idx - d[:, 0], g_idx + d[:, 1]
        inter = np.clip(np.minimum(px2, x2) - np.maximum(px1, x1), 0, None)
        union = (px2 - px1) + (x2 - x1) - inter
        lb += (1.0 - inter / (union + 1e-7)).mean()

        def enc(c):
            c = np.clip(c, 0, reg_max - 1.01)
            f = np.floor(c).astype(np.int64)
            out = np.zeros((n, reg_max))
            out[np.arange(n), f] = f + 1 - c
            out[np.arange(n), f + 1] = c - f
            return out

        def ce(lg, tg):
            m = lg.max(1, keepdims=True)
            lse = m + np.log(np.exp(lg - m).sum(1, keepdims=True))
            return -(tg * (lg - lse)).sum(1)

        ld += (ce(pb[:, :reg_max], enc(g_idx - x1))
               + ce(pb[:, reg_max:], enc(x2 - g_idx))).mean()
    total = lb * hyp['box'] + lc * hyp['cls'] + ld * hyp['dfl']
    return np.array([lb, lc, ld, total])


if __name__ == "__main__":
    key = jax.random.PRNGKey(0)
    B = 2
    C_TOT = 2 * REG_MAX + NUM_CLASSES
    lengths = [32, 16, 8]               # P3, P4, P5 (1-D feature-map lengths)
    keys = jax.random.split(key, len(lengths))
    preds = [jax.random.normal(k, (B, C_TOT, L), dtype=jnp.float32)
             for k, L in zip(keys, lengths)]

    # targets: [image_idx, class, x_center(norm), width(norm)]
    targets = np.array([[0.0,  3.0, 0.25, 0.10],
                        [0.0, 10.0, 0.70, 0.20],
                        [1.0,  5.0, 0.40, 0.15],
                        [1.0, 22.0, 0.85, 0.30]], dtype=np.float32)

    total, items = yolo1d_loss(preds, targets)
    total = jax.block_until_ready(total)
    items = jax.block_until_ready(items)

    ref = _ref_loss([np.asarray(p) for p in preds], targets)
    np.testing.assert_allclose(np.asarray(items), ref, rtol=1e-4, atol=1e-4)
    assert np.isfinite(float(total))
    print("KERNEL_OK")
</pallas_src>

<mosaic_0001>
module attributes {stable_mosaic.version = 11 : i64} {
  func.func @_yolo_loss_kernel(%arg0: memref<3x16x112xf32, #tpu.memory_space<vmem>>, %arg1: memref<3x16x8xf32, #tpu.memory_space<vmem>>, %arg2: memref<4xf32, #tpu.memory_space<smem>>) attributes {dimension_semantics = [], scalar_prefetch = 0 : i64, scratch_operands = 0 : i64, tpu.core_type = #tpu.core_type<tc>} {
    %0 = tpu.iota {dimensions = array<i32: 1>} : vector<16x16xi32>
    %1 = arith.sitofp %0 : vector<16x16xi32> to vector<16x16xf32>
    %2 = tpu.iota {dimensions = array<i32: 1>} : vector<16x80xi32>
    %3 = arith.sitofp %2 : vector<16x80xi32> to vector<16x80xf32>
    %c0 = arith.constant 0 : index
    %c0_0 = arith.constant 0 : index
    %c0_1 = arith.constant 0 : index
    %4 = vector.load %arg0[%c0, %c0_0, %c0_1] : memref<3x16x112xf32, #tpu.memory_space<vmem>>, vector<1x16x112xf32>
    %5 = vector.shape_cast %4 : vector<1x16x112xf32> to vector<16x112xf32>
    %6 = vector.extract_strided_slice %5 {offsets = [0, 0], sizes = [16, 16], strides = [1, 1]} : vector<16x112xf32> to vector<16x16xf32>
    %7 = vector.extract_strided_slice %5 {offsets = [0, 16], sizes = [16, 16], strides = [1, 1]} : vector<16x112xf32> to vector<16x16xf32>
    %8 = vector.extract_strided_slice %5 {offsets = [0, 32], sizes = [16, 80], strides = [1, 1]} : vector<16x112xf32> to vector<16x80xf32>
    %c0_2 = arith.constant 0 : index
    %c0_3 = arith.constant 0 : index
    %c0_4 = arith.constant 0 : index
    %9 = vector.load %arg1[%c0_2, %c0_3, %c0_4] : memref<3x16x8xf32, #tpu.memory_space<vmem>>, vector<1x16x8xf32>
    %10 = vector.shape_cast %9 : vector<1x16x8xf32> to vector<16x8xf32>
    %11 = vector.extract_strided_slice %10 {offsets = [0, 0], sizes = [16, 1], strides = [1, 1]} : vector<16x8xf32> to vector<16x1xf32>
    %12 = vector.extract_strided_slice %10 {offsets = [0, 1], sizes = [16, 1], strides = [1, 1]} : vector<16x8xf32> to vector<16x1xf32>
    %13 = vector.extract_strided_slice %10 {offsets = [0, 2], sizes = [16, 1], strides = [1, 1]} : vector<16x8xf32> to vector<16x1xf32>
    %14 = vector.extract_strided_slice %10 {offsets = [0, 3], sizes = [16, 1], strides = [1, 1]} : vector<16x8xf32> to vector<16x1xf32>
    %15 = vector.extract_strided_slice %10 {offsets = [0, 4], sizes = [16, 1], strides = [1, 1]} : vector<16x8xf32> to vector<16x1xf32>
    %16 = vector.shape_cast %15 : vector<16x1xf32> to vector<1x16x1xf32>
    %cst = arith.constant dense<0.000000e+00> : vector<1xf32>
    %17 = vector.multi_reduction <add>, %16, %cst [1, 2] : vector<1x16x1xf32> to vector<1xf32>
    %18 = vector.shape_cast %17 : vector<1xf32> to vector<1x1x1xf32>
    %19 = vector.extract %18[0, 0, 0] : f32 from vector<1x1x1xf32>
    %cst_5 = arith.constant 1.000000e+00 : f32
    %20 = arith.maximumf %19, %cst_5 : f32
    %21 = vector.broadcast %14 : vector<16x1xf32> to vector<16x80xf32>
    %22 = arith.cmpf oeq, %3, %21 : vector<16x80xf32>
    %cst_6 = arith.constant 1.000000e+00 : f32
    %cst_7 = arith.constant 0.000000e+00 : f32
    %23 = vector.broadcast %cst_6 : f32 to vector<16x80xf32>
    %24 = vector.broadcast %cst_7 : f32 to vector<16x80xf32>
    %25 = arith.select %22, %23, %24 : vector<16x80xi1>, vector<16x80xf32>
    %cst_8 = arith.constant 0.899999976 : f32
    %26 = vector.broadcast %cst_8 : f32 to vector<16x80xf32>
    %27 = arith.mulf %25, %26 : vector<16x80xf32>
    %cst_9 = arith.constant 1.250000e-03 : f32
    %28 = vector.broadcast %cst_9 : f32 to vector<16x80xf32>
    %29 = arith.addf %27, %28 : vector<16x80xf32>
    %cst_10 = arith.constant 0.000000e+00 : f32
    %30 = vector.broadcast %cst_10 : f32 to vector<16x80xf32>
    %31 = arith.maximumf %8, %30 : vector<16x80xf32>
    %32 = arith.mulf %8, %29 : vector<16x80xf32>
    %33 = arith.subf %31, %32 : vector<16x80xf32>
    %34 = math.absf %8 : vector<16x80xf32>
    %cst_11 = arith.constant 0.000000e+00 : f32
    %35 = vector.broadcast %cst_11 : f32 to vector<16x80xf32>
    %36 = arith.subf %35, %34 : vector<16x80xf32>
    %37 = math.exp %36 : vector<16x80xf32>
    %cst_12 = arith.constant 1.000000e+00 : f32
    %38 = vector.broadcast %cst_12 : f32 to vector<16x80xf32>
    %39 = arith.addf %38, %37 : vector<16x80xf32>
    %40 = math.log %39 : vector<16x80xf32>
    %41 = arith.addf %33, %40 : vector<16x80xf32>
    %42 = vector.broadcast %15 : vector<16x1xf32> to vector<16x80xf32>
    %43 = arith.mulf %41, %42 : vector<16x80xf32>
    %44 = vector.shape_cast %43 : vector<16x80xf32> to vector<1x16x80xf32>
    %cst_13 = arith.constant dense<0.000000e+00> : vector<1xf32>
    %45 = vector.multi_reduction <add>, %44, %cst_13 [1, 2] : vector<1x16x80xf32> to vector<1xf32>
    %46 = vector.shape_cast %45 : vector<1xf32> to vector<1x1x1xf32>
    %47 = vector.extract %46[0, 0, 0] : f32 from vector<1x1x1xf32>
    %cst_14 = arith.constant 8.000000e+01 : f32
    %48 = arith.mulf %20, %cst_14 : f32
    %49 = arith.divf %47, %48 : f32
    %cst_15 = arith.constant 0.000000e+00 : f32
    %50 = arith.addf %cst_15, %49 : f32
    %cst_16 = arith.constant dense<0xFF800000> : vector<16xf32>
    %51 = vector.multi_reduction <maximumf>, %6, %cst_16 [1] : vector<16x16xf32> to vector<16xf32>
    %52 = vector.shape_cast %51 : vector<16xf32> to vector<16x1xf32>
    %53 = vector.broadcast %52 : vector<16x1xf32> to vector<16x16xf32>
    %54 = arith.subf %6, %53 : vector<16x16xf32>
    %55 = math.exp %54 : vector<16x16xf32>
    %cst_17 = arith.constant dense<0.000000e+00> : vector<16xf32>
    %56 = vector.multi_reduction <add>, %55, %cst_17 [1] : vector<16x16xf32> to vector<16xf32>
    %57 = vector.shape_cast %56 : vector<16xf32> to vector<16x1xf32>
    %58 = arith.mulf %55, %1 : vector<16x16xf32>
    %cst_18 = arith.constant dense<0.000000e+00> : vector<16xf32>
    %59 = vector.multi_reduction <add>, %58, %cst_18 [1] : vector<16x16xf32> to vector<16xf32>
    %60 = vector.shape_cast %59 : vector<16xf32> to vector<16x1xf32>
    %61 = arith.divf %60, %57 : vector<16x1xf32>
    %62 = math.log %57 : vector<16x1xf32>
    %63 = arith.addf %52, %62 : vector<16x1xf32>
    %cst_19 = arith.constant dense<0xFF800000> : vector<16xf32>
    %64 = vector.multi_reduction <maximumf>, %7, %cst_19 [1] : vector<16x16xf32> to vector<16xf32>
    %65 = vector.shape_cast %64 : vector<16xf32> to vector<16x1xf32>
    %66 = vector.broadcast %65 : vector<16x1xf32> to vector<16x16xf32>
    %67 = arith.subf %7, %66 : vector<16x16xf32>
    %68 = math.exp %67 : vector<16x16xf32>
    %cst_20 = arith.constant dense<0.000000e+00> : vector<16xf32>
    %69 = vector.multi_reduction <add>, %68, %cst_20 [1] : vector<16x16xf32> to vector<16xf32>
    %70 = vector.shape_cast %69 : vector<16xf32> to vector<16x1xf32>
    %71 = arith.mulf %68, %1 : vector<16x16xf32>
    %cst_21 = arith.constant dense<0.000000e+00> : vector<16xf32>
    %72 = vector.multi_reduction <add>, %71, %cst_21 [1] : vector<16x16xf32> to vector<16xf32>
    %73 = vector.shape_cast %72 : vector<16xf32> to vector<16x1xf32>
    %74 = arith.divf %73, %70 : vector<16x1xf32>
    %75 = math.log %70 : vector<16x1xf32>
    %76 = arith.addf %65, %75 : vector<16x1xf32>
    %77 = arith.subf %11, %61 : vector<16x1xf32>
    %78 = arith.addf %11, %74 : vector<16x1xf32>
    %79 = arith.minimumf %78, %13 : vector<16x1xf32>
    %80 = arith.maximumf %77, %12 : vector<16x1xf32>
    %81 = arith.subf %79, %80 : vector<16x1xf32>
    %cst_22 = arith.constant 0.000000e+00 : f32
    %82 = vector.broadcast %cst_22 : f32 to vector<16x1xf32>
    %83 = arith.maximumf %81, %82 : vector<16x1xf32>
    %84 = arith.subf %78, %77 : vector<16x1xf32>
    %85 = arith.subf %13, %12 : vector<16x1xf32>
    %86 = arith.addf %84, %85 : vector<16x1xf32>
    %87 = arith.subf %86, %83 : vector<16x1xf32>
    %cst_23 = arith.constant 1.000000e-07 : f32
    %88 = vector.broadcast %cst_23 : f32 to vector<16x1xf32>
    %89 = arith.addf %87, %88 : vector<16x1xf32>
    %90 = arith.divf %83, %89 : vector<16x1xf32>
    %cst_24 = arith.constant 1.000000e+00 : f32
    %91 = vector.broadcast %cst_24 : f32 to vector<16x1xf32>
    %92 = arith.subf %91, %90 : vector<16x1xf32>
    %93 = arith.mulf %92, %15 : vector<16x1xf32>
    %94 = vector.shape_cast %93 : vector<16x1xf32> to vector<1x16x1xf32>
    %cst_25 = arith.constant dense<0.000000e+00> : vector<1xf32>
    %95 = vector.multi_reduction <add>, %94, %cst_25 [1, 2] : vector<1x16x1xf32> to vector<1xf32>
    %96 = vector.shape_cast %95 : vector<1xf32> to vector<1x1x1xf32>
    %97 = vector.extract %96[0, 0, 0] : f32 from vector<1x1x1xf32>
    %98 = arith.divf %97, %20 : f32
    %cst_26 = arith.constant 0.000000e+00 : f32
    %99 = arith.addf %cst_26, %98 : f32
    %100 = arith.subf %11, %12 : vector<16x1xf32>
    %cst_27 = arith.constant 0.000000e+00 : f32
    %cst_28 = arith.constant 1.499000e+01 : f32
    %101 = vector.broadcast %cst_27 : f32 to vector<16x1xf32>
    %102 = arith.maximumf %101, %100 : vector<16x1xf32>
    %103 = vector.broadcast %cst_28 : f32 to vector<16x1xf32>
    %104 = arith.minimumf %103, %102 : vector<16x1xf32>
    %105 = math.floor %104 : vector<16x1xf32>
    %106 = vector.broadcast %105 : vector<16x1xf32> to vector<16x16xf32>
    %107 = arith.cmpf oeq, %1, %106 : vector<16x16xf32>
    %cst_29 = arith.constant 1.000000e+00 : f32
    %108 = vector.broadcast %cst_29 : f32 to vector<16x1xf32>
    %109 = arith.addf %105, %108 : vector<16x1xf32>
    %110 = arith.subf %109, %104 : vector<16x1xf32>
    %cst_30 = arith.constant 0.000000e+00 : f32
    %111 = vector.shape_cast %110 : vector<16x1xf32> to vector<16x1xf32>
    %112 = vector.broadcast %111 : vector<16x1xf32> to vector<16x16xf32>
    %113 = vector.broadcast %cst_30 : f32 to vector<16x16xf32>
    %114 = arith.select %107, %112, %113 : vector<16x16xi1>, vector<16x16xf32>
    %cst_31 = arith.constant 1.000000e+00 : f32
    %115 = vector.broadcast %cst_31 : f32 to vector<16x1xf32>
    %116 = arith.addf %105, %115 : vector<16x1xf32>
    %117 = vector.broadcast %116 : vector<16x1xf32> to vector<16x16xf32>
    %118 = arith.cmpf oeq, %1, %117 : vector<16x16xf32>
    %119 = arith.subf %104, %105 : vector<16x1xf32>
    %cst_32 = arith.constant 0.000000e+00 : f32
    %120 = vector.shape_cast %119 : vector<16x1xf32> to vector<16x1xf32>
    %121 = vector.broadcast %120 : vector<16x1xf32> to vector<16x16xf32>
    %122 = vector.broadcast %cst_32 : f32 to vector<16x16xf32>
    %123 = arith.select %118, %121, %122 : vector<16x16xi1>, vector<16x16xf32>
    %124 = arith.addf %114, %123 : vector<16x16xf32>
    %125 = arith.mulf %124, %6 : vector<16x16xf32>
    %cst_33 = arith.constant dense<0.000000e+00> : vector<16xf32>
    %126 = vector.multi_reduction <add>, %125, %cst_33 [1] : vector<16x16xf32> to vector<16xf32>
    %127 = vector.shape_cast %126 : vector<16xf32> to vector<16x1xf32>
    %128 = arith.subf %63, %127 : vector<16x1xf32>
    %129 = arith.subf %13, %11 : vector<16x1xf32>
    %cst_34 = arith.constant 0.000000e+00 : f32
    %cst_35 = arith.constant 1.499000e+01 : f32
    %130 = vector.broadcast %cst_34 : f32 to vector<16x1xf32>
    %131 = arith.maximumf %130, %129 : vector<16x1xf32>
    %132 = vector.broadcast %cst_35 : f32 to vector<16x1xf32>
    %133 = arith.minimumf %132, %131 : vector<16x1xf32>
    %134 = math.floor %133 : vector<16x1xf32>
    %135 = vector.broadcast %134 : vector<16x1xf32> to vector<16x16xf32>
    %136 = arith.cmpf oeq, %1, %135 : vector<16x16xf32>
    %cst_36 = arith.constant 1.000000e+00 : f32
    %137 = vector.broadcast %cst_36 : f32 to vector<16x1xf32>
    %138 = arith.addf %134, %137 : vector<16x1xf32>
    %139 = arith.subf %138, %133 : vector<16x1xf32>
    %cst_37 = arith.constant 0.000000e+00 : f32
    %140 = vector.shape_cast %139 : vector<16x1xf32> to vector<16x1xf32>
    %141 = vector.broadcast %140 : vector<16x1xf32> to vector<16x16xf32>
    %142 = vector.broadcast %cst_37 : f32 to vector<16x16xf32>
    %143 = arith.select %136, %141, %142 : vector<16x16xi1>, vector<16x16xf32>
    %cst_38 = arith.constant 1.000000e+00 : f32
    %144 = vector.broadcast %cst_38 : f32 to vector<16x1xf32>
    %145 = arith.addf %134, %144 : vector<16x1xf32>
    %146 = vector.broadcast %145 : vector<16x1xf32> to vector<16x16xf32>
    %147 = arith.cmpf oeq, %1, %146 : vector<16x16xf32>
    %148 = arith.subf %133, %134 : vector<16x1xf32>
    %cst_39 = arith.constant 0.000000e+00 : f32
    %149 = vector.shape_cast %148 : vector<16x1xf32> to vector<16x1xf32>
    %150 = vector.broadcast %149 : vector<16x1xf32> to vector<16x16xf32>
    %151 = vector.broadcast %cst_39 : f32 to vector<16x16xf32>
    %152 = arith.select %147, %150, %151 : vector<16x16xi1>, vector<16x16xf32>
    %153 = arith.addf %143, %152 : vector<16x16xf32>
    %154 = arith.mulf %153, %7 : vector<16x16xf32>
    %cst_40 = arith.constant dense<0.000000e+00> : vector<16xf32>
    %155 = vector.multi_reduction <add>, %154, %cst_40 [1] : vector<16x16xf32> to vector<16xf32>
    %156 = vector.shape_cast %155 : vector<16xf32> to vector<16x1xf32>
    %157 = arith.subf %76, %156 : vector<16x1xf32>
    %158 = arith.addf %128, %157 : vector<16x1xf32>
    %159 = arith.mulf %158, %15 : vector<16x1xf32>
    %160 = vector.shape_cast %159 : vector<16x1xf32> to vector<1x16x1xf32>
    %cst_41 = arith.constant dense<0.000000e+00> : vector<1xf32>
    %161 = vector.multi_reduction <add>, %160, %cst_41 [1, 2] : vector<1x16x1xf32> to vector<1xf32>
    %162 = vector.shape_cast %161 : vector<1xf32> to vector<1x1x1xf32>
    %163 = vector.extract %162[0, 0, 0] : f32 from vector<1x1x1xf32>
    %164 = arith.divf %163, %20 : f32
    %cst_42 = arith.constant 0.000000e+00 : f32
    %165 = arith.addf %cst_42, %164 : f32
    %c1 = arith.constant 1 : index
    %c0_43 = arith.constant 0 : index
    %c0_44 = arith.constant 0 : index
    %166 = vector.load %arg0[%c1, %c0_43, %c0_44] : memref<3x16x112xf32, #tpu.memory_space<vmem>>, vector<1x16x112xf32>
    %167 = vector.shape_cast %166 : vector<1x16x112xf32> to vector<16x112xf32>
    %168 = vector.extract_strided_slice %167 {offsets = [0, 0], sizes = [16, 16], strides = [1, 1]} : vector<16x112xf32> to vector<16x16xf32>
    %169 = vector.extract_strided_slice %167 {offsets = [0, 16], sizes = [16, 16], strides = [1, 1]} : vector<16x112xf32> to vector<16x16xf32>
    %170 = vector.extract_strided_slice %167 {offsets = [0, 32], sizes = [16, 80], strides = [1, 1]} : vector<16x112xf32> to vector<16x80xf32>
    %c1_45 = arith.constant 1 : index
    %c0_46 = arith.constant 0 : index
    %c0_47 = arith.constant 0 : index
    %171 = vector.load %arg1[%c1_45, %c0_46, %c0_47] : memref<3x16x8xf32, #tpu.memory_space<vmem>>, vector<1x16x8xf32>
    %172 = vector.shape_cast %171 : vector<1x16x8xf32> to vector<16x8xf32>
    %173 = vector.extract_strided_slice %172 {offsets = [0, 0], sizes = [16, 1], strides = [1, 1]} : vector<16x8xf32> to vector<16x1xf32>
    %174 = vector.extract_strided_slice %172 {offsets = [0, 1], sizes = [16, 1], strides = [1, 1]} : vector<16x8xf32> to vector<16x1xf32>
    %175 = vector.extract_strided_slice %172 {offsets = [0, 2], sizes = [16, 1], strides = [1, 1]} : vector<16x8xf32> to vector<16x1xf32>
    %176 = vector.extract_strided_slice %172 {offsets = [0, 3], sizes = [16, 1], strides = [1, 1]} : vector<16x8xf32> to vector<16x1xf32>
    %177 = vector.extract_strided_slice %172 {offsets = [0, 4], sizes = [16, 1], strides = [1, 1]} : vector<16x8xf32> to vector<16x1xf32>
    %178 = vector.shape_cast %177 : vector<16x1xf32> to vector<1x16x1xf32>
    %cst_48 = arith.constant dense<0.000000e+00> : vector<1xf32>
    %179 = vector.multi_reduction <add>, %178, %cst_48 [1, 2] : vector<1x16x1xf32> to vector<1xf32>
    %180 = vector.shape_cast %179 : vector<1xf32> to vector<1x1x1xf32>
    %181 = vector.extract %180[0, 0, 0] : f32 from vector<1x1x1xf32>
    %cst_49 = arith.constant 1.000000e+00 : f32
    %182 = arith.maximumf %181, %cst_49 : f32
    %183 = vector.broadcast %176 : vector<16x1xf32> to vector<16x80xf32>
    %184 = arith.cmpf oeq, %3, %183 : vector<16x80xf32>
    %cst_50 = arith.constant 1.000000e+00 : f32
    %cst_51 = arith.constant 0.000000e+00 : f32
    %185 = vector.broadcast %cst_50 : f32 to vector<16x80xf32>
    %186 = vector.broadcast %cst_51 : f32 to vector<16x80xf32>
    %187 = arith.select %184, %185, %186 : vector<16x80xi1>, vector<16x80xf32>
    %cst_52 = arith.constant 0.899999976 : f32
    %188 = vector.broadcast %cst_52 : f32 to vector<16x80xf32>
    %189 = arith.mulf %187, %188 : vector<16x80xf32>
    %cst_53 = arith.constant 1.250000e-03 : f32
    %190 = vector.broadcast %cst_53 : f32 to vector<16x80xf32>
    %191 = arith.addf %189, %190 : vector<16x80xf32>
    %cst_54 = arith.constant 0.000000e+00 : f32
    %192 = vector.broadcast %cst_54 : f32 to vector<16x80xf32>
    %193 = arith.maximumf %170, %192 : vector<16x80xf32>
    %194 = arith.mulf %170, %191 : vector<16x80xf32>
    %195 = arith.subf %193, %194 : vector<16x80xf32>
    %196 = math.absf %170 : vector<16x80xf32>
    %cst_55 = arith.constant 0.000000e+00 : f32
    %197 = vector.broadcast %cst_55 : f32 to vector<16x80xf32>
    %198 = arith.subf %197, %196 : vector<16x80xf32>
    %199 = math.exp %198 : vector<16x80xf32>
    %cst_56 = arith.constant 1.000000e+00 : f32
    %200 = vector.broadcast %cst_56 : f32 to vector<16x80xf32>
    %201 = arith.addf %200, %199 : vector<16x80xf32>
    %202 = math.log %201 : vector<16x80xf32>
    %203 = arith.addf %195, %202 : vector<16x80xf32>
    %204 = vector.broadcast %177 : vector<16x1xf32> to vector<16x80xf32>
    %205 = arith.mulf %203, %204 : vector<16x80xf32>
    %206 = vector.shape_cast %205 : vector<16x80xf32> to vector<1x16x80xf32>
    %cst_57 = arith.constant dense<0.000000e+00> : vector<1xf32>
    %207 = vector.multi_reduction <add>, %206, %cst_57 [1, 2] : vector<1x16x80xf32> to vector<1xf32>
    %208 = vector.shape_cast %207 : vector<1xf32> to vector<1x1x1xf32>
    %209 = vector.extract %208[0, 0, 0] : f32 from vector<1x1x1xf32>
    %cst_58 = arith.constant 8.000000e+01 : f32
    %210 = arith.mulf %182, %cst_58 : f32
    %211 = arith.divf %209, %210 : f32
    %212 = arith.addf %50, %211 : f32
    %cst_59 = arith.constant dense<0xFF800000> : vector<16xf32>
    %213 = vector.multi_reduction <maximumf>, %168, %cst_59 [1] : vector<16x16xf32> to vector<16xf32>
    %214 = vector.shape_cast %213 : vector<16xf32> to vector<16x1xf32>
    %215 = vector.broadcast %214 : vector<16x1xf32> to vector<16x16xf32>
    %216 = arith.subf %168, %215 : vector<16x16xf32>
    %217 = math.exp %216 : vector<16x16xf32>
    %cst_60 = arith.constant dense<0.000000e+00> : vector<16xf32>
    %218 = vector.multi_reduction <add>, %217, %cst_60 [1] : vector<16x16xf32> to vector<16xf32>
    %219 = vector.shape_cast %218 : vector<16xf32> to vector<16x1xf32>
    %220 = arith.mulf %217, %1 : vector<16x16xf32>
    %cst_61 = arith.constant dense<0.000000e+00> : vector<16xf32>
    %221 = vector.multi_reduction <add>, %220, %cst_61 [1] : vector<16x16xf32> to vector<16xf32>
    %222 = vector.shape_cast %221 : vector<16xf32> to vector<16x1xf32>
    %223 = arith.divf %222, %219 : vector<16x1xf32>
    %224 = math.log %219 : vector<16x1xf32>
    %225 = arith.addf %214, %224 : vector<16x1xf32>
    %cst_62 = arith.constant dense<0xFF800000> : vector<16xf32>
    %226 = vector.multi_reduction <maximumf>, %169, %cst_62 [1] : vector<16x16xf32> to vector<16xf32>
    %227 = vector.shape_cast %226 : vector<16xf32> to vector<16x1xf32>
    %228 = vector.broadcast %227 : vector<16x1xf32> to vector<16x16xf32>
    %229 = arith.subf %169, %228 : vector<16x16xf32>
    %230 = math.exp %229 : vector<16x16xf32>
    %cst_63 = arith.constant dense<0.000000e+00> : vector<16xf32>
    %231 = vector.multi_reduction <add>, %230, %cst_63 [1] : vector<16x16xf32> to vector<16xf32>
    %232 = vector.shape_cast %231 : vector<16xf32> to vector<16x1xf32>
    %233 = arith.mulf %230, %1 : vector<16x16xf32>
    %cst_64 = arith.constant dense<0.000000e+00> : vector<16xf32>
    %234 = vector.multi_reduction <add>, %233, %cst_64 [1] : vector<16x16xf32> to vector<16xf32>
    %235 = vector.shape_cast %234 : vector<16xf32> to vector<16x1xf32>
    %236 = arith.divf %235, %232 : vector<16x1xf32>
    %237 = math.log %232 : vector<16x1xf32>
    %238 = arith.addf %227, %237 : vector<16x1xf32>
    %239 = arith.subf %173, %223 : vector<16x1xf32>
    %240 = arith.addf %173, %236 : vector<16x1xf32>
    %241 = arith.minimumf %240, %175 : vector<16x1xf32>
    %242 = arith.maximumf %239, %174 : vector<16x1xf32>
    %243 = arith.subf %241, %242 : vector<16x1xf32>
    %cst_65 = arith.constant 0.000000e+00 : f32
    %244 = vector.broadcast %cst_65 : f32 to vector<16x1xf32>
    %245 = arith.maximumf %243, %244 : vector<16x1xf32>
    %246 = arith.subf %240, %239 : vector<16x1xf32>
    %247 = arith.subf %175, %174 : vector<16x1xf32>
    %248 = arith.addf %246, %247 : vector<16x1xf32>
    %249 = arith.subf %248, %245 : vector<16x1xf32>
    %cst_66 = arith.constant 1.000000e-07 : f32
    %250 = vector.broadcast %cst_66 : f32 to vector<16x1xf32>
    %251 = arith.addf %249, %250 : vector<16x1xf32>
    %252 = arith.divf %245, %251 : vector<16x1xf32>
    %cst_67 = arith.constant 1.000000e+00 : f32
    %253 = vector.broadcast %cst_67 : f32 to vector<16x1xf32>
    %254 = arith.subf %253, %252 : vector<16x1xf32>
    %255 = arith.mulf %254, %177 : vector<16x1xf32>
    %256 = vector.shape_cast %255 : vector<16x1xf32> to vector<1x16x1xf32>
    %cst_68 = arith.constant dense<0.000000e+00> : vector<1xf32>
    %257 = vector.multi_reduction <add>, %256, %cst_68 [1, 2] : vector<1x16x1xf32> to vector<1xf32>
    %258 = vector.shape_cast %257 : vector<1xf32> to vector<1x1x1xf32>
    %259 = vector.extract %258[0, 0, 0] : f32 from vector<1x1x1xf32>
    %260 = arith.divf %259, %182 : f32
    %261 = arith.addf %99, %260 : f32
    %262 = arith.subf %173, %174 : vector<16x1xf32>
    %cst_69 = arith.constant 0.000000e+00 : f32
    %cst_70 = arith.constant 1.499000e+01 : f32
    %263 = vector.broadcast %cst_69 : f32 to vector<16x1xf32>
    %264 = arith.maximumf %263, %262 : vector<16x1xf32>
    %265 = vector.broadcast %cst_70 : f32 to vector<16x1xf32>
    %266 = arith.minimumf %265, %264 : vector<16x1xf32>
    %267 = math.floor %266 : vector<16x1xf32>
    %268 = vector.broadcast %267 : vector<16x1xf32> to vector<16x16xf32>
    %269 = arith.cmpf oeq, %1, %268 : vector<16x16xf32>
    %cst_71 = arith.constant 1.000000e+00 : f32
    %270 = vector.broadcast %cst_71 : f32 to vector<16x1xf32>
    %271 = arith.addf %267, %270 : vector<16x1xf32>
    %272 = arith.subf %271, %266 : vector<16x1xf32>
    %cst_72 = arith.constant 0.000000e+00 : f32
    %273 = vector.shape_cast %272 : vector<16x1xf32> to vector<16x1xf32>
    %274 = vector.broadcast %273 : vector<16x1xf32> to vector<16x16xf32>
    %275 = vector.broadcast %cst_72 : f32 to vector<16x16xf32>
    %276 = arith.select %269, %274, %275 : vector<16x16xi1>, vector<16x16xf32>
    %cst_73 = arith.constant 1.000000e+00 : f32
    %277 = vector.broadcast %cst_73 : f32 to vector<16x1xf32>
    %278 = arith.addf %267, %277 : vector<16x1xf32>
    %279 = vector.broadcast %278 : vector<16x1xf32> to vector<16x16xf32>
    %280 = arith.cmpf oeq, %1, %279 : vector<16x16xf32>
    %281 = arith.subf %266, %267 : vector<16x1xf32>
    %cst_74 = arith.constant 0.000000e+00 : f32
    %282 = vector.shape_cast %281 : vector<16x1xf32> to vector<16x1xf32>
    %283 = vector.broadcast %282 : vector<16x1xf32> to vector<16x16xf32>
    %284 = vector.broadcast %cst_74 : f32 to vector<16x16xf32>
    %285 = arith.select %280, %283, %284 : vector<16x16xi1>, vector<16x16xf32>
    %286 = arith.addf %276, %285 : vector<16x16xf32>
    %287 = arith.mulf %286, %168 : vector<16x16xf32>
    %cst_75 = arith.constant dense<0.000000e+00> : vector<16xf32>
    %288 = vector.multi_reduction <add>, %287, %cst_75 [1] : vector<16x16xf32> to vector<16xf32>
    %289 = vector.shape_cast %288 : vector<16xf32> to vector<16x1xf32>
    %290 = arith.subf %225, %289 : vector<16x1xf32>
    %291 = arith.subf %175, %173 : vector<16x1xf32>
    %cst_76 = arith.constant 0.000000e+00 : f32
    %cst_77 = arith.constant 1.499000e+01 : f32
    %292 = vector.broadcast %cst_76 : f32 to vector<16x1xf32>
    %293 = arith.maximumf %292, %291 : vector<16x1xf32>
    %294 = vector.broadcast %cst_77 : f32 to vector<16x1xf32>
    %295 = arith.minimumf %294, %293 : vector<16x1xf32>
    %296 = math.floor %295 : vector<16x1xf32>
    %297 = vector.broadcast %296 : vector<16x1xf32> to vector<16x16xf32>
    %298 = arith.cmpf oeq, %1, %297 : vector<16x16xf32>
    %cst_78 = arith.constant 1.000000e+00 : f32
    %299 = vector.broadcast %cst_78 : f32 to vector<16x1xf32>
    %300 = arith.addf %296, %299 : vector<16x1xf32>
    %301 = arith.subf %300, %295 : vector<16x1xf32>
    %cst_79 = arith.constant 0.000000e+00 : f32
    %302 = vector.shape_cast %301 : vector<16x1xf32> to vector<16x1xf32>
    %303 = vector.broadcast %302 : vector<16x1xf32> to vector<16x16xf32>
    %304 = vector.broadcast %cst_79 : f32 to vector<16x16xf32>
    %305 = arith.select %298, %303, %304 : vector<16x16xi1>, vector<16x16xf32>
    %cst_80 = arith.constant 1.000000e+00 : f32
    %306 = vector.broadcast %cst_80 : f32 to vector<16x1xf32>
    %307 = arith.addf %296, %306 : vector<16x1xf32>
    %308 = vector.broadcast %307 : vector<16x1xf32> to vector<16x16xf32>
    %309 = arith.cmpf oeq, %1, %308 : vector<16x16xf32>
    %310 = arith.subf %295, %296 : vector<16x1xf32>
    %cst_81 = arith.constant 0.000000e+00 : f32
    %311 = vector.shape_cast %310 : vector<16x1xf32> to vector<16x1xf32>
    %312 = vector.broadcast %311 : vector<16x1xf32> to vector<16x16xf32>
    %313 = vector.broadcast %cst_81 : f32 to vector<16x16xf32>
    %314 = arith.select %309, %312, %313 : vector<16x16xi1>, vector<16x16xf32>
    %315 = arith.addf %305, %314 : vector<16x16xf32>
    %316 = arith.mulf %315, %169 : vector<16x16xf32>
    %cst_82 = arith.constant dense<0.000000e+00> : vector<16xf32>
    %317 = vector.multi_reduction <add>, %316, %cst_82 [1] : vector<16x16xf32> to vector<16xf32>
    %318 = vector.shape_cast %317 : vector<16xf32> to vector<16x1xf32>
    %319 = arith.subf %238, %318 : vector<16x1xf32>
    %320 = arith.addf %290, %319 : vector<16x1xf32>
    %321 = arith.mulf %320, %177 : vector<16x1xf32>
    %322 = vector.shape_cast %321 : vector<16x1xf32> to vector<1x16x1xf32>
    %cst_83 = arith.constant dense<0.000000e+00> : vector<1xf32>
    %323 = vector.multi_reduction <add>, %322, %cst_83 [1, 2] : vector<1x16x1xf32> to vector<1xf32>
    %324 = vector.shape_cast %323 : vector<1xf32> to vector<1x1x1xf32>
    %325 = vector.extract %324[0, 0, 0] : f32 from vector<1x1x1xf32>
    %326 = arith.divf %325, %182 : f32
    %327 = arith.addf %165, %326 : f32
    %c2 = arith.constant 2 : index
    %c0_84 = arith.constant 0 : index
    %c0_85 = arith.constant 0 : index
    %328 = vector.load %arg0[%c2, %c0_84, %c0_85] : memref<3x16x112xf32, #tpu.memory_space<vmem>>, vector<1x16x112xf32>
    %329 = vector.shape_cast %328 : vector<1x16x112xf32> to vector<16x112xf32>
    %330 = vector.extract_strided_slice %329 {offsets = [0, 0], sizes = [16, 16], strides = [1, 1]} : vector<16x112xf32> to vector<16x16xf32>
    %331 = vector.extract_strided_slice %329 {offsets = [0, 16], sizes = [16, 16], strides = [1, 1]} : vector<16x112xf32> to vector<16x16xf32>
    %332 = vector.extract_strided_slice %329 {offsets = [0, 32], sizes = [16, 80], strides = [1, 1]} : vector<16x112xf32> to vector<16x80xf32>
    %c2_86 = arith.constant 2 : index
    %c0_87 = arith.constant 0 : index
    %c0_88 = arith.constant 0 : index
    %333 = vector.load %arg1[%c2_86, %c0_87, %c0_88] : memref<3x16x8xf32, #tpu.memory_space<vmem>>, vector<1x16x8xf32>
    %334 = vector.shape_cast %333 : vector<1x16x8xf32> to vector<16x8xf32>
    %335 = vector.extract_strided_slice %334 {offsets = [0, 0], sizes = [16, 1], strides = [1, 1]} : vector<16x8xf32> to vector<16x1xf32>
    %336 = vector.extract_strided_slice %334 {offsets = [0, 1], sizes = [16, 1], strides = [1, 1]} : vector<16x8xf32> to vector<16x1xf32>
    %337 = vector.extract_strided_slice %334 {offsets = [0, 2], sizes = [16, 1], strides = [1, 1]} : vector<16x8xf32> to vector<16x1xf32>
    %338 = vector.extract_strided_slice %334 {offsets = [0, 3], sizes = [16, 1], strides = [1, 1]} : vector<16x8xf32> to vector<16x1xf32>
    %339 = vector.extract_strided_slice %334 {offsets = [0, 4], sizes = [16, 1], strides = [1, 1]} : vector<16x8xf32> to vector<16x1xf32>
    %340 = vector.shape_cast %339 : vector<16x1xf32> to vector<1x16x1xf32>
    %cst_89 = arith.constant dense<0.000000e+00> : vector<1xf32>
    %341 = vector.multi_reduction <add>, %340, %cst_89 [1, 2] : vector<1x16x1xf32> to vector<1xf32>
    %342 = vector.shape_cast %341 : vector<1xf32> to vector<1x1x1xf32>
    %343 = vector.extract %342[0, 0, 0] : f32 from vector<1x1x1xf32>
    %cst_90 = arith.constant 1.000000e+00 : f32
    %344 = arith.maximumf %343, %cst_90 : f32
    %345 = vector.broadcast %338 : vector<16x1xf32> to vector<16x80xf32>
    %346 = arith.cmpf oeq, %3, %345 : vector<16x80xf32>
    %cst_91 = arith.constant 1.000000e+00 : f32
    %cst_92 = arith.constant 0.000000e+00 : f32
    %347 = vector.broadcast %cst_91 : f32 to vector<16x80xf32>
    %348 = vector.broadcast %cst_92 : f32 to vector<16x80xf32>
    %349 = arith.select %346, %347, %348 : vector<16x80xi1>, vector<16x80xf32>
    %cst_93 = arith.constant 0.899999976 : f32
    %350 = vector.broadcast %cst_93 : f32 to vector<16x80xf32>
    %351 = arith.mulf %349, %350 : vector<16x80xf32>
    %cst_94 = arith.constant 1.250000e-03 : f32
    %352 = vector.broadcast %cst_94 : f32 to vector<16x80xf32>
    %353 = arith.addf %351, %352 : vector<16x80xf32>
    %cst_95 = arith.constant 0.000000e+00 : f32
    %354 = vector.broadcast %cst_95 : f32 to vector<16x80xf32>
    %355 = arith.maximumf %332, %354 : vector<16x80xf32>
    %356 = arith.mulf %332, %353 : vector<16x80xf32>
    %357 = arith.subf %355, %356 : vector<16x80xf32>
    %358 = math.absf %332 : vector<16x80xf32>
    %cst_96 = arith.constant 0.000000e+00 : f32
    %359 = vector.broadcast %cst_96 : f32 to vector<16x80xf32>
    %360 = arith.subf %359, %358 : vector<16x80xf32>
    %361 = math.exp %360 : vector<16x80xf32>
    %cst_97 = arith.constant 1.000000e+00 : f32
    %362 = vector.broadcast %cst_97 : f32 to vector<16x80xf32>
    %363 = arith.addf %362, %361 : vector<16x80xf32>
    %364 = math.log %363 : vector<16x80xf32>
    %365 = arith.addf %357, %364 : vector<16x80xf32>
    %366 = vector.broadcast %339 : vector<16x1xf32> to vector<16x80xf32>
    %367 = arith.mulf %365, %366 : vector<16x80xf32>
    %368 = vector.shape_cast %367 : vector<16x80xf32> to vector<1x16x80xf32>
    %cst_98 = arith.constant dense<0.000000e+00> : vector<1xf32>
    %369 = vector.multi_reduction <add>, %368, %cst_98 [1, 2] : vector<1x16x80xf32> to vector<1xf32>
    %370 = vector.shape_cast %369 : vector<1xf32> to vector<1x1x1xf32>
    %371 = vector.extract %370[0, 0, 0] : f32 from vector<1x1x1xf32>
    %cst_99 = arith.constant 8.000000e+01 : f32
    %372 = arith.mulf %344, %cst_99 : f32
    %373 = arith.divf %371, %372 : f32
    %374 = arith.addf %212, %373 : f32
    %cst_100 = arith.constant dense<0xFF800000> : vector<16xf32>
    %375 = vector.multi_reduction <maximumf>, %330, %cst_100 [1] : vector<16x16xf32> to vector<16xf32>
    %376 = vector.shape_cast %375 : vector<16xf32> to vector<16x1xf32>
    %377 = vector.broadcast %376 : vector<16x1xf32> to vector<16x16xf32>
    %378 = arith.subf %330, %377 : vector<16x16xf32>
    %379 = math.exp %378 : vector<16x16xf32>
    %cst_101 = arith.constant dense<0.000000e+00> : vector<16xf32>
    %380 = vector.multi_reduction <add>, %379, %cst_101 [1] : vector<16x16xf32> to vector<16xf32>
    %381 = vector.shape_cast %380 : vector<16xf32> to vector<16x1xf32>
    %382 = arith.mulf %379, %1 : vector<16x16xf32>
    %cst_102 = arith.constant dense<0.000000e+00> : vector<16xf32>
    %383 = vector.multi_reduction <add>, %382, %cst_102 [1] : vector<16x16xf32> to vector<16xf32>
    %384 = vector.shape_cast %383 : vector<16xf32> to vector<16x1xf32>
    %385 = arith.divf %384, %381 : vector<16x1xf32>
    %386 = math.log %381 : vector<16x1xf32>
    %387 = arith.addf %376, %386 : vector<16x1xf32>
    %cst_103 = arith.constant dense<0xFF800000> : vector<16xf32>
    %388 = vector.multi_reduction <maximumf>, %331, %cst_103 [1] : vector<16x16xf32> to vector<16xf32>
    %389 = vector.shape_cast %388 : vector<16xf32> to vector<16x1xf32>
    %390 = vector.broadcast %389 : vector<16x1xf32> to vector<16x16xf32>
    %391 = arith.subf %331, %390 : vector<16x16xf32>
    %392 = math.exp %391 : vector<16x16xf32>
    %cst_104 = arith.constant dense<0.000000e+00> : vector<16xf32>
    %393 = vector.multi_reduction <add>, %392, %cst_104 [1] : vector<16x16xf32> to vector<16xf32>
    %394 = vector.shape_cast %393 : vector<16xf32> to vector<16x1xf32>
    %395 = arith.mulf %392, %1 : vector<16x16xf32>
    %cst_105 = arith.constant dense<0.000000e+00> : vector<16xf32>
    %396 = vector.multi_reduction <add>, %395, %cst_105 [1] : vector<16x16xf32> to vector<16xf32>
    %397 = vector.shape_cast %396 : vector<16xf32> to vector<16x1xf32>
    %398 = arith.divf %397, %394 : vector<16x1xf32>
    %399 = math.log %394 : vector<16x1xf32>
    %400 = arith.addf %389, %399 : vector<16x1xf32>
    %401 = arith.subf %335, %385 : vector<16x1xf32>
    %402 = arith.addf %335, %398 : vector<16x1xf32>
    %403 = arith.minimumf %402, %337 : vector<16x1xf32>
    %404 = arith.maximumf %401, %336 : vector<16x1xf32>
    %405 = arith.subf %403, %404 : vector<16x1xf32>
    %cst_106 = arith.constant 0.000000e+00 : f32
    %406 = vector.broadcast %cst_106 : f32 to vector<16x1xf32>
    %407 = arith.maximumf %405, %406 : vector<16x1xf32>
    %408 = arith.subf %402, %401 : vector<16x1xf32>
    %409 = arith.subf %337, %336 : vector<16x1xf32>
    %410 = arith.addf %408, %409 : vector<16x1xf32>
    %411 = arith.subf %410, %407 : vector<16x1xf32>
    %cst_107 = arith.constant 1.000000e-07 : f32
    %412 = vector.broadcast %cst_107 : f32 to vector<16x1xf32>
    %413 = arith.addf %411, %412 : vector<16x1xf32>
    %414 = arith.divf %407, %413 : vector<16x1xf32>
    %cst_108 = arith.constant 1.000000e+00 : f32
    %415 = vector.broadcast %cst_108 : f32 to vector<16x1xf32>
    %416 = arith.subf %415, %414 : vector<16x1xf32>
    %417 = arith.mulf %416, %339 : vector<16x1xf32>
    %418 = vector.shape_cast %417 : vector<16x1xf32> to vector<1x16x1xf32>
    %cst_109 = arith.constant dense<0.000000e+00> : vector<1xf32>
    %419 = vector.multi_reduction <add>, %418, %cst_109 [1, 2] : vector<1x16x1xf32> to vector<1xf32>
    %420 = vector.shape_cast %419 : vector<1xf32> to vector<1x1x1xf32>
    %421 = vector.extract %420[0, 0, 0] : f32 from vector<1x1x1xf32>
    %422 = arith.divf %421, %344 : f32
    %423 = arith.addf %261, %422 : f32
    %424 = arith.subf %335, %336 : vector<16x1xf32>
    %cst_110 = arith.constant 0.000000e+00 : f32
    %cst_111 = arith.constant 1.499000e+01 : f32
    %425 = vector.broadcast %cst_110 : f32 to vector<16x1xf32>
    %426 = arith.maximumf %425, %424 : vector<16x1xf32>
    %427 = vector.broadcast %cst_111 : f32 to vector<16x1xf32>
    %428 = arith.minimumf %427, %426 : vector<16x1xf32>
    %429 = math.floor %428 : vector<16x1xf32>
    %430 = vector.broadcast %429 : vector<16x1xf32> to vector<16x16xf32>
    %431 = arith.cmpf oeq, %1, %430 : vector<16x16xf32>
    %cst_112 = arith.constant 1.000000e+00 : f32
    %432 = vector.broadcast %cst_112 : f32 to vector<16x1xf32>
    %433 = arith.addf %429, %432 : vector<16x1xf32>
    %434 = arith.subf %433, %428 : vector<16x1xf32>
    %cst_113 = arith.constant 0.000000e+00 : f32
    %435 = vector.shape_cast %434 : vector<16x1xf32> to vector<16x1xf32>
    %436 = vector.broadcast %435 : vector<16x1xf32> to vector<16x16xf32>
    %437 = vector.broadcast %cst_113 : f32 to vector<16x16xf32>
    %438 = arith.select %431, %436, %437 : vector<16x16xi1>, vector<16x16xf32>
    %cst_114 = arith.constant 1.000000e+00 : f32
    %439 = vector.broadcast %cst_114 : f32 to vector<16x1xf32>
    %440 = arith.addf %429, %439 : vector<16x1xf32>
    %441 = vector.broadcast %440 : vector<16x1xf32> to vector<16x16xf32>
    %442 = arith.cmpf oeq, %1, %441 : vector<16x16xf32>
    %443 = arith.subf %428, %429 : vector<16x1xf32>
    %cst_115 = arith.constant 0.000000e+00 : f32
    %444 = vector.shape_cast %443 : vector<16x1xf32> to vector<16x1xf32>
    %445 = vector.broadcast %444 : vector<16x1xf32> to vector<16x16xf32>
    %446 = vector.broadcast %cst_115 : f32 to vector<16x16xf32>
    %447 = arith.select %442, %445, %446 : vector<16x16xi1>, vector<16x16xf32>
    %448 = arith.addf %438, %447 : vector<16x16xf32>
    %449 = arith.mulf %448, %330 : vector<16x16xf32>
    %cst_116 = arith.constant dense<0.000000e+00> : vector<16xf32>
    %450 = vector.multi_reduction <add>, %449, %cst_116 [1] : vector<16x16xf32> to vector<16xf32>
    %451 = vector.shape_cast %450 : vector<16xf32> to vector<16x1xf32>
    %452 = arith.subf %387, %451 : vector<16x1xf32>
    %453 = arith.subf %337, %335 : vector<16x1xf32>
    %cst_117 = arith.constant 0.000000e+00 : f32
    %cst_118 = arith.constant 1.499000e+01 : f32
    %454 = vector.broadcast %cst_117 : f32 to vector<16x1xf32>
    %455 = arith.maximumf %454, %453 : vector<16x1xf32>
    %456 = vector.broadcast %cst_118 : f32 to vector<16x1xf32>
    %457 = arith.minimumf %456, %455 : vector<16x1xf32>
    %458 = math.floor %457 : vector<16x1xf32>
    %459 = vector.broadcast %458 : vector<16x1xf32> to vector<16x16xf32>
    %460 = arith.cmpf oeq, %1, %459 : vector<16x16xf32>
    %cst_119 = arith.constant 1.000000e+00 : f32
    %461 = vector.broadcast %cst_119 : f32 to vector<16x1xf32>
    %462 = arith.addf %458, %461 : vector<16x1xf32>
    %463 = arith.subf %462, %457 : vector<16x1xf32>
    %cst_120 = arith.constant 0.000000e+00 : f32
    %464 = vector.shape_cast %463 : vector<16x1xf32> to vector<16x1xf32>
    %465 = vector.broadcast %464 : vector<16x1xf32> to vector<16x16xf32>
    %466 = vector.broadcast %cst_120 : f32 to vector<16x16xf32>
    %467 = arith.select %460, %465, %466 : vector<16x16xi1>, vector<16x16xf32>
    %cst_121 = arith.constant 1.000000e+00 : f32
    %468 = vector.broadcast %cst_121 : f32 to vector<16x1xf32>
    %469 = arith.addf %458, %468 : vector<16x1xf32>
    %470 = vector.broadcast %469 : vector<16x1xf32> to vector<16x16xf32>
    %471 = arith.cmpf oeq, %1, %470 : vector<16x16xf32>
    %472 = arith.subf %457, %458 : vector<16x1xf32>
    %cst_122 = arith.constant 0.000000e+00 : f32
    %473 = vector.shape_cast %472 : vector<16x1xf32> to vector<16x1xf32>
    %474 = vector.broadcast %473 : vector<16x1xf32> to vector<16x16xf32>
    %475 = vector.broadcast %cst_122 : f32 to vector<16x16xf32>
    %476 = arith.select %471, %474, %475 : vector<16x16xi1>, vector<16x16xf32>
    %477 = arith.addf %467, %476 : vector<16x16xf32>
    %478 = arith.mulf %477, %331 : vector<16x16xf32>
    %cst_123 = arith.constant dense<0.000000e+00> : vector<16xf32>
    %479 = vector.multi_reduction <add>, %478, %cst_123 [1] : vector<16x16xf32> to vector<16xf32>
    %480 = vector.shape_cast %479 : vector<16xf32> to vector<16x1xf32>
    %481 = arith.subf %400, %480 : vector<16x1xf32>
    %482 = arith.addf %452, %481 : vector<16x1xf32>
    %483 = arith.mulf %482, %339 : vector<16x1xf32>
    %484 = vector.shape_cast %483 : vector<16x1xf32> to vector<1x16x1xf32>
    %cst_124 = arith.constant dense<0.000000e+00> : vector<1xf32>
    %485 = vector.multi_reduction <add>, %484, %cst_124 [1, 2] : vector<1x16x1xf32> to vector<1xf32>
    %486 = vector.shape_cast %485 : vector<1xf32> to vector<1x1x1xf32>
    %487 = vector.extract %486[0, 0, 0] : f32 from vector<1x1x1xf32>
    %488 = arith.divf %487, %344 : f32
    %489 = arith.addf %327, %488 : f32
    %c0_125 = arith.constant 0 : index
    %490 = memref.load %arg2[%c0_125] : memref<4xf32, #tpu.memory_space<smem>>
    memref.store %423, %arg2[%c0_125] : memref<4xf32, #tpu.memory_space<smem>>
    %c1_126 = arith.constant 1 : index
    %491 = memref.load %arg2[%c1_126] : memref<4xf32, #tpu.memory_space<smem>>
    memref.store %374, %arg2[%c1_126] : memref<4xf32, #tpu.memory_space<smem>>
    %c2_127 = arith.constant 2 : index
    %492 = memref.load %arg2[%c2_127] : memref<4xf32, #tpu.memory_space<smem>>
    memref.store %489, %arg2[%c2_127] : memref<4xf32, #tpu.memory_space<smem>>
    %cst_128 = arith.constant 7.500000e+00 : f32
    %493 = arith.mulf %423, %cst_128 : f32
    %cst_129 = arith.constant 5.000000e-01 : f32
    %494 = arith.mulf %374, %cst_129 : f32
    %495 = arith.addf %493, %494 : f32
    %cst_130 = arith.constant 1.500000e+00 : f32
    %496 = arith.mulf %489, %cst_130 : f32
    %497 = arith.addf %495, %496 : f32
    %c3 = arith.constant 3 : index
    %498 = memref.load %arg2[%c3] : memref<4xf32, #tpu.memory_space<smem>>
    memref.store %497, %arg2[%c3] : memref<4xf32, #tpu.memory_space<smem>>
    return
  }
}

</mosaic_0001>

<bundles_post_ra>
// kernel: _device_loss.1
= control target key start
LH: loop header
LB: loop body
LE: loop exit
PB: predicated region body
PF: predicated region fallthrough
CT: control target
= control target key end

     0   :  { %v1646_v1 = vmov 3   ;;  %s1647_s11 = smov 124   ;;  %s2400_s0 = inlined_call_operand.vmem [shape: f32[3,16,112], index: 0, kind: input, shape index: {}]   ;;  %s2401_s1 = inlined_call_operand.vmem [shape: f32[3,16,8], index: 1, kind: input, shape index: {}]   ;;  %s2402_s2 = inlined_call_operand.hbm [shape: f32[4], index: 2, kind: output, shape index: {}]  }
   0x1   :  { %v1680_v0 = vld [vmem:[%s2401_s1] sm:$0xff]  ;;  %1490 = vset.pattern.permute.xlu1 %v1646_v1  ;;  %v1689_v2 = vld [vmem:[%s2401_s1 + $0x8] sm:$0xff]  ;;  %1491 = vset.pattern.permute.xlu0 %v1646_v1 }
   0x2   :  { %21 = vrot.lane.b32.xlu0 %v1680_v0, %s1647_s11  ;;  %42 = vperm.xlu1 %1490, %v1680_v0  }
   0x3   :  { %7 = vsyncpa [#allocation3], 0  ;;  %v1648_v3 = vmov 4   ;;  %v1702_v4 = vld [vmem:[%s2400_s0] sm:$0xff]  ;;  %vm124_vm0 = vcmask 130048   ;;  %v1707_v5 = vld [vmem:[%s2400_s0 + $0x8] sm:$0xff]  ;;  %v12_v10 = vlaneseq }
   0x4   :  { %v125_v6 = vsel %vm124_vm0, %v1702_v4, -inf  ;;  %vm161_vm1 = vcmask 261248   ;;  %v128_v7 = vsel %vm124_vm0, %v1707_v5, -inf  ;;  %s1649_s18 = smov 126   ;;  %s1650_s19 = smov 127   ;;  %v1653_v13 = vmov 0  }
   0x5   :  { %v165_v8 = vsel %vm161_vm1, %v1707_v5, -inf  ;;  %v162_v9 = vsel %vm161_vm1, %v1702_v4, -inf  ;;  %v13_v11 = vand.u32 127, %v12_v10  ;;  %s1651_s20 = smov 16   ;;  %s1652_s21 = smov 1   ;;  %v1654_v37 = vmov 0.0  }
   0x6   :  { %23 = vrot.lane.b32.xlu0 %v1689_v2, %s1647_s11  ;;  %1492 = vset.pattern.permute.xlu1 %v1648_v3  ;;  %s1655_s22 = smov 32   ;;  %s1656_s23 = smov 112   ;;  %vm27_vm4 = vcmask 7168   ;;  %vm105_vm13 = vcmask 654336  }
   0x7   :  { %88 = vperm.xlu1 %1492, %v1680_v0   ;;  %v1719_v12 = vcvt.s32.f32 %v13_v11  ;;  %s1657_s24 = smov 96   ;;  %s1658_s25 = smov 2  }
   0x8   :  { %s1660_s3 = smov 1.0  }
   0xa   :  { %46 = vperm.xlu0 %1491, %v1689_v2  }
   0xb   :  { %1494 = vset.pattern.permute.xlu1 %v1653_v13 }
   0xe   :  { %1493 = vset.pattern.permute.xlu0 %v1648_v3 }
   0xf   :  { %92 = vperm.xlu0 %1493, %v1689_v2  }
  0x2b   :  { %126 = vmax.xlane.f32.xlu1 %v125_v6 }
  0x2e   :  { %129 = vmax.xlane.f32.xlu0 %v128_v7 }
  0x2f   :  { %166 = vmax.xlane.f32.xlu1 %v165_v8 }
  0x32   :  { %163 = vmax.xlane.f32.xlu0 %v162_v9 }
  0x40   :  { %224 = vrot.lane.b32.xlu1 %v1689_v2, %s1649_s18 }
  0x44   :  { %232 = vrot.lane.b32.xlu1 %v1689_v2, %s1650_s19 }
  0x48   :  { %189 = vrot.lane.b32.xlu0 %v1719_v12, %s1651_s20  ;;  %246 = vrot.lane.b32.xlu1 %v1689_v2, %s1652_s21 }
  0x4c   :  { %222 = vrot.lane.b32.xlu0 %v1680_v0, %s1649_s18 }
  0x50   :  { %230 = vrot.lane.b32.xlu0 %v1680_v0, %s1650_s19 }
  0x54   :  { %244 = vrot.lane.b32.xlu0 %v1680_v0, %s1652_s21 }
  0x74   :  { %v1733_v14 = vpop.permute.xlu0 %21 }
  0x75   :  { %v28_v55 = vsel %vm27_vm4, %v1733_v14, 0.0 }
  0x78   :  { %v1735_v15 = vpop.permute.xlu0 %23 }
  0x79   :  { %v29_v56 = vsel %vm27_vm4, %v1735_v15, 0.0 }
  0x7a   :  { %v30_v57 = vadd.f32 %v29_v56, %v28_v55 }
  0x81   :  { %v43_v16 = vpop.permute.xlu1 %42 }
  0x82   :  { %vm49_vm2 = vcmp.eq.f32.partialorder %v1719_v12, %v43_v16 }
  0x83   :  { %v51_v38 = vsel %vm49_vm2, 1.0, %v1654_v37 }
  0x84   :  { %v53_v43 = vmul.f32 0.9, %v51_v38 }
  0x86   :  { %v1737_v18 = vpop.permute.xlu1 %88  ;;  %v55_v48 = vadd.f32 0.00125, %v53_v43 }
  0x89   :  { %v47_v17 = vpop.permute.xlu0 %46 }
  0x8a   :  { %vm50_vm3 = vcmp.eq.f32.partialorder %v1719_v12, %v47_v17 }
  0x8b   :  { %v52_v46 = vsel %vm50_vm3, 1.0, %v1654_v37 }
  0x8c   :  { %v54_v49 = vmul.f32 0.9, %v52_v46 }
  0x8e   :  { %v1739_v19 = vpop.permute.xlu0 %92  ;;  %v56_v51 = vadd.f32 0.00125, %v54_v49 }
  0xb8   :  { %v1741_v20 = vpop.xlane.xlu1 %126 }
  0xb9   :  { %v131_v53 = vsub.f32 %v1702_v4, %v1741_v20 }
  0xbb   :  { %v1743_v21 = vpop.xlane.xlu0 %129  ;;  %v133_v54 = vmul.f32 1.442695, %v131_v53 }
  0xbc   :  { %v1745_v22 = vpop.xlane.xlu1 %166  ;;  %v132_v11 = vsub.f32 %v1707_v5, %v1743_v21 }
  0xbd   :  { %v169_v62 = vsub.f32 %v1707_v5, %v1745_v22 }
  0xbe   :  { %v135_v16 = vmul.f32 1.442695, %v132_v11 }
  0xbf   :  { %v1747_v23 = vpop.xlane.xlu0 %163  ;;  %v172_v6 = vmul.f32 1.442695, %v169_v62 }
  0xc0   :  { %v1749_v24 = vpop.permute.xlu1 %224  ;;  %v168_v30 = vsub.f32 %v1702_v4, %v1747_v23 }
  0xc2   :  { %v170_v39 = vmul.f32 1.442695, %v168_v30 }
  0xc3   :  { %v1751_v25 = vpop.permute.xlu0 %189 }
  0xc4   :  { %v1753_v26 = vpop.permute.xlu1 %232  ;;  %1512 = vpow2.f32 %v170_v39 }
  0xc5   :  { %v292_v27 = vsub.f32 %v1689_v2, %v1753_v26  ;;  %1514 = vpow2.f32 %v133_v54 }
  0xc6   :  { %1516 = vpow2.f32 %v172_v6 }
  0xc7   :  { %v1757_v28 = vpop.permute.xlu0 %222  ;;  %v294_v29 = vmax.f32 %v292_v27, 0.0  ;;  %1518 = vpow2.f32 %v135_v16 }
  0xc8   :  { %v247_v31 = vpop.permute.xlu1 %246 }
  0xc9   :  { %v1762_v32 = vmin.f32 %v294_v29, 14.99  ;;  %v251_v33 = vsub.f32 %v1689_v2, %v247_v31  ;;  %v71_v31 = vand.u32 2147483647, %v1702_v4 }
  0xcb   :  { %v1765_v34 = vpop.permute.xlu0 %230  ;;  %256 = vrot.lane.b32.xlu1 %v251_v33, %s1649_s18  ;;  %v1771_v36 = vfloor.f32 %v1762_v32  ;;  %v73_v33 = vsub.f32 0.0, %v71_v31 }
  0xcc   :  { %v291_v35 = vsub.f32 %v1680_v0, %v1765_v34 }
  0xcd   :  { %v340_v41 = vsub.f32 %v1762_v32, %v1771_v36  ;;  %v312_v7 = vadd.f32 1.0, %v1771_v36  ;;  %v75_v38 = vmul.f32 1.442695, %v73_v33 }
  0xce   :  { %v293_v40 = vmax.f32 %v291_v35, 0.0  ;;  %v1513_v52 = vpop.eup %1512  ;;  %v72_v35 = vand.u32 2147483647, %v1707_v5 }
  0xcf   :  { %v245_v42 = vpop.permute.xlu0 %244  ;;  %v1515_v58 = vpop.eup %1514  ;;  %v314_v9 = vsub.f32 %v312_v7, %v1762_v32  ;;  %v192_v29 = vmul.f32 %v1513_v52, %v1751_v25  ;;  %1520 = vpow2.f32 %v75_v38 }
  0xd0   :  { %v1777_v44 = vmin.f32 %v293_v40, 14.99  ;;  %v250_v45 = vsub.f32 %v1680_v0, %v245_v42  ;;  %v137_v59 = vsel %vm124_vm0, %v1515_v58, 0.0  ;;  %v143_v60 = vmul.f32 %v1515_v58, %v1719_v12  ;;  %v1517_v10 = vpop.eup %1516 }
  0xd1   :  { %v1519_v17 = vpop.eup %1518  ;;  %v193_v30 = vmul.f32 %v1517_v10, %v1751_v25  ;;  %v74_v39 = vsub.f32 0.0, %v72_v35 }
  0xd2   :  { %254 = vrot.lane.b32.xlu0 %v250_v45, %s1649_s18  ;;  %v1783_v47 = vfloor.f32 %v1777_v44  ;;  %v145_v61 = vsel %vm124_vm0, %v143_v60, 0.0  ;;  %v140_v27 = vsel %vm124_vm0, %v1519_v17, 0.0  ;;  %v144_v43 = vmul.f32 %v1519_v17, %v1719_v12 }
  0xd3   :  { %v77_v40 = vmul.f32 1.442695, %v74_v39 }
  0xd4   :  { %v339_v50 = vsub.f32 %v1777_v44, %v1783_v47  ;;  %v311_v63 = vadd.f32 1.0, %v1783_v47 }
  0xd5   :  { %1522 = vpow2.f32 %v77_v40 }
  0xd6   :  { %61 = vrot.lane.b32.xlu0 %v55_v48, %s1655_s22  ;;  %v313_v8 = vsub.f32 %v311_v63, %v1777_v44  ;;  %v148_v48 = vsel %vm124_vm0, %v144_v43, 0.0 }
  0xd9   :  { %v1521_v42 = vpop.eup %1520 }
  0xda   :  { %63 = vrot.lane.b32.xlu0 %v56_v51, %s1655_s22  ;;  %v79_v45 = vadd.f32 1.0, %v1521_v42 }
  0xdc   :  { %1524 = vlog2.f32 %v79_v45 }
  0xde   :  { %176 = vrot.lane.b32.xlu0 %v1513_v52, %s1656_s23 }
  0xdf   :  { %v1523_v46 = vpop.eup %1522 }
  0xe0   :  { %v80_v51 = vadd.f32 1.0, %v1523_v46 }
  0xe2   :  { %1526 = vlog2.f32 %v80_v51 }
  0xef   :  { %31 = vadd.xlane.f32.xlu1 %v30_v57  ;;  %v57_v57 = vmax.f32 %v1702_v4, 0.0 }
  0xfd   :  { %138 = vadd.xlane.f32.xlu0 %v137_v59  ;;  %v1525_v59 = vpop.eup %1524 }
 0x100   :  { %301 = vperm.xlu1 %1494, %v1783_v47  }
 0x101   :  { %146 = vadd.xlane.f32.xlu0 %v145_v61 }
 0x104   :  { %306 = vperm.xlu1 %1494, %v1771_v36  }
 0x108   :  { %329 = vperm.xlu1 %1494, %v311_v63   ;;  %v82_v63 = vmul.f32 0.6931472, %v1525_v59 }
 0x10c   :  { %334 = vperm.xlu1 %1494, %v312_v7   ;;  %v58_v7 = vmax.f32 %v1707_v5, 0.0 }
 0x110   :  { %317 = vperm.xlu1 %1494, %v313_v8  }
 0x114   :  { %322 = vperm.xlu1 %1494, %v314_v9   ;;  %v1527_v9 = vpop.eup %1526 }
 0x115   :  { %v84_v17 = vmul.f32 0.6931472, %v1527_v9 }
 0x118   :  { %178 = vrot.lane.b32.xlu1 %v1517_v10, %s1656_s23 }
 0x13c   :  { %141 = vadd.xlane.f32.xlu1 %v140_v27 }
 0x13d   :  { %v1821_v52 = vpop.permute.xlu1 %256 }
 0x144   :  { %v1819_v49 = vpop.permute.xlu0 %254 }
 0x148   :  { %v62_v53 = vpop.permute.xlu0 %61 }
 0x149   :  { %v67_v58 = vmul.f32 %v62_v53, %v1702_v4 }
 0x14b   :  { %v69_v6 = vsub.f32 %v57_v57, %v67_v58 }
 0x14c   :  { %v64_v60 = vpop.permute.xlu0 %63 }
 0x14d   :  { %196 = vrot.lane.b32.xlu1 %v192_v29, %s1656_s23  ;;  %v68_v8 = vmul.f32 %v64_v60, %v1707_v5  ;;  %v85_v16 = vadd.f32 %v82_v63, %v69_v6 }
 0x14f   :  { %v70_v27 = vsub.f32 %v58_v7, %v68_v8 }
 0x150   :  { %v177_v33 = vpop.permute.xlu0 %176 }
 0x151   :  { %198 = vrot.lane.b32.xlu1 %v193_v30, %s1656_s23  ;;  %v86_v29 = vadd.f32 %v84_v17, %v70_v27  ;;  %v95_v30 = vmul.f32 %v1737_v18, %v85_v16  ;;  %v182_v38 = vsel %vm124_vm0, %v177_v33, 0.0 }
 0x153   :  { %v96_v31 = vmul.f32 %v1739_v19, %v86_v29 }
 0x175   :  { %149 = vadd.xlane.f32.xlu1 %v148_v48 }
 0x17c   :  { %v32_v54 = vpop.xlane.xlu1 %31 }
 0x17d   :  { %v33_v55 = vrot.slane %v32_v54, 4 }
 0x17f   :  { %v34_v56 = vadd.f32 %v33_v55, %v32_v54 }
 0x180   :  { %v302_v44 = vpop.permute.xlu1 %301 }
 0x181   :  { %v35_v61 = vrot.slane %v34_v56, 2  ;;  %vm309_vm5 = vcmp.eq.f32.partialorder %v1719_v12, %v302_v44 }
 0x183   :  { %v36_v62 = vadd.f32 %v35_v61, %v34_v56 }
 0x184   :  { %v307_v47 = vpop.permute.xlu1 %306 }
 0x185   :  { %v37_v10 = vrot.slane %v36_v62, 1  ;;  %vm310_vm7 = vcmp.eq.f32.partialorder %v1719_v12, %v307_v47 }
 0x186   :  { %343 = vperm.xlu1 %1494, %v339_v50  }
 0x187   :  { %v38_v11 = vadd.f32 %v37_v10, %v36_v62  ;;  %v1659_v62 = vmov 2  }
 0x188   :  { %v330_v50 = vpop.permute.xlu1 %329  ;;  %1495 = vset.pattern.permute.xlu0 %v1659_v62 }
 0x189   :  { %1438 = vpush %v38_v11  ;;  %vm337_vm6 = vcmp.eq.f32.partialorder %v1719_v12, %v330_v50 }
 0x18a   :  { %348 = vperm.xlu1 %1494, %v340_v41   ;;  %v1859_v63 = vpop.xlane.xlu0 %138 }
 0x18b   :  { %1528 = vlog2.f32 %v1859_v63 }
 0x18c   :  { %v335_v35 = vpop.permute.xlu1 %334 }
 0x18d   :  { %vm338_vm8 = vcmp.eq.f32.partialorder %v1719_v12, %v335_v35 }
 0x18e   :  { %99 = vrot.lane.b32.xlu1 %v95_v30, %s1657_s24  ;;  %v1861_v6 = vpop.xlane.xlu0 %146 }
 0x18f   :  { %1496 = vset.pattern.permute.xlu1 %v1659_v62 }
 0x190   :  { %v318_v32 = vpop.permute.xlu1 %317 }
 0x191   :  { %v325_v45 = vsel %vm309_vm5, %v318_v32, 0.0 }
 0x192   :  { %101 = vrot.lane.b32.xlu1 %v96_v31, %s1657_s24 }
 0x194   :  { %v323_v36 = vpop.permute.xlu1 %322 }
 0x195   :  { %v326_v54 = vsel %vm310_vm7, %v323_v36, 0.0 }
 0x198   :  { %v179_v41 = vpop.permute.xlu1 %178 }
 0x199   :  { %v185_v59 = vsel %vm124_vm0, %v179_v41, 0.0 }
 0x1b6   :  { %183 = vadd.xlane.f32.xlu1 %v182_v38 }
 0x1ba   :  { %s1439_s30 = spop %1438 }
 0x1bb   :  { %s1928_s4 = smax.f32 %s1660_s3, %s1439_s30 }
 0x1bc   :  { %s118_s5 = smul.f32 80.0, %s1928_s4 }
 0x1c9   :  { %v1838_v39 = vpop.xlane.xlu1 %141 }
 0x1cd   :  { %v197_v18 = vpop.permute.xlu1 %196 }
 0x1ce   :  { %v202_v61 = vsel %vm124_vm0, %v197_v18, 0.0 }
 0x1d1   :  { %v199_v40 = vpop.permute.xlu1 %198 }
 0x1d2   :  { %v205_v42 = vsel %vm124_vm0, %v199_v40, 0.0 }
 0x1d3   :  { %206 = vadd.xlane.f32.xlu1 %v205_v42 }
 0x202   :  { %v1841_v19 = vpop.xlane.xlu1 %149 }
 0x206   :  { %v344_v43 = vpop.permute.xlu1 %343 }
 0x207   :  { %v351_v46 = vsel %vm337_vm6, %v344_v43, 0.0 }
 0x208   :  { %v353_v48 = vadd.f32 %v351_v46, %v325_v45 }
 0x20a   :  { %v349_v51 = vpop.permute.xlu1 %348  ;;  %v355_v53 = vmul.f32 %v353_v48, %v1702_v4 }
 0x20b   :  { %v352_v55 = vsel %vm338_vm8, %v349_v51, 0.0 }
 0x20c   :  { %v354_v56 = vadd.f32 %v352_v55, %v326_v54  ;;  %v357_v57 = vsel %vm124_vm0, %v355_v53, 0.0 }
 0x20d   :  { %358 = vadd.xlane.f32.xlu0 %v357_v57 }
 0x20e   :  { %v356_v58 = vmul.f32 %v354_v56, %v1707_v5  ;;  %v100_v41 = vpop.permute.xlu1 %99 }
 0x210   :  { %v360_v60 = vsel %vm124_vm0, %v356_v58, 0.0 }
 0x211   :  { %186 = vadd.xlane.f32.xlu0 %v185_v59  ;;  %361 = vadd.xlane.f32.xlu1 %v360_v60 }
 0x212   :  { %v102_v18 = vpop.permute.xlu1 %101 }
 0x215   :  { %203 = vadd.xlane.f32.xlu0 %v202_v61 }
 0x22b   :  { %365 = vrot.lane.b32.xlu0 %v1680_v0, %s1658_s25 }
 0x22f   :  { %367 = vrot.lane.b32.xlu0 %v1689_v2, %s1658_s25 }
 0x243   :  { %v1877_v40 = vpop.xlane.xlu1 %183 }
 0x244   :  { %1530 = vlog2.f32 %v1877_v40 }
 0x260   :  { %v1879_v42 = vpop.xlane.xlu1 %206 }
 0x29a   :  { %v1863_v7 = vpop.xlane.xlu0 %358 }
 0x29e   :  { %v1865_v8 = vpop.xlane.xlu0 %186  ;;  %v1881_v45 = vpop.xlane.xlu1 %361 }
 0x2a2   :  { %v1867_v9 = vpop.xlane.xlu0 %203 }
 0x2a6   :  { %v366_v10 = vpop.permute.xlu0 %365 }
 0x2a7   :  { %v371_v11 = vsub.f32 %v1680_v0, %v366_v10 }
 0x2a9   :  { %v373_v16 = vmax.f32 %v371_v11, 0.0 }
 0x2aa   :  { %v368_v17 = vpop.permute.xlu0 %367 }
 0x2ab   :  { %v375_v27 = vmin.f32 %v373_v16, 14.99  ;;  %v372_v29 = vsub.f32 %v1689_v2, %v368_v17 }
 0x2ad   :  { %v374_v30 = vmax.f32 %v372_v29, 0.0  ;;  %v377_v31 = vfloor.f32 %v375_v27  ;;  %v1892_v29 = vld [vmem:[%s2401_s1 + $0x10] sm:$0xff] }
 0x2af   :  { %v376_v44 = vmin.f32 %v374_v30, 14.99  ;;  %381 = vperm.xlu0 %1495, %v377_v31   ;;  %v391_v47 = vadd.f32 1.0, %v377_v31  ;;  %v419_v36 = vsub.f32 %v375_v27, %v377_v31  ;;  %v1899_v30 = vld [vmem:[%s2401_s1 + $0x18] sm:$0xff]  ;;  %v107_v31 = vsel %vm105_vm13, %v102_v18, 0.0 }
 0x2b1   :  { %v393_v50 = vsub.f32 %v391_v47, %v375_v27  ;;  %v378_v33 = vfloor.f32 %v376_v44 }
 0x2b3   :  { %397 = vperm.xlu1 %1496, %v393_v50   ;;  %386 = vperm.xlu0 %1495, %v378_v33   ;;  %v392_v35 = vadd.f32 1.0, %v378_v33  ;;  %v420_v38 = vsub.f32 %v376_v44, %v378_v33  ;;  %v1529_v50 = vpop.eup %1528 }
 0x2b4   :  { %v1531_v33 = vpop.eup %1530 }
 0x2b5   :  { %v394_v32 = vsub.f32 %v392_v35, %v376_v44  ;;  %v106_v44 = vsel %vm105_vm13, %v100_v41, 0.0 }
 0x2b7   :  { %428 = vperm.xlu1 %1496, %v420_v38   ;;  %402 = vperm.xlu0 %1495, %v394_v32   ;;  %v213_v38 = vmul.f32 0.6931472, %v1531_v33 }
 0x2bb   :  { %409 = vperm.xlu0 %1495, %v391_v47   ;;  %439 = vrot.lane.b32.xlu1 %v1707_v5, %s1656_s23  ;;  %v108_v47 = vadd.f32 %v107_v31, %v106_v44 }
 0x2bc   :  { %1498 = vset.pattern.permute.xlu1 %v1646_v1 }
 0x2bf   :  { %414 = vperm.xlu0 %1495, %v392_v35   ;;  %v156_v35 = vmul.f32 0.6931472, %v1529_v50 }
 0x2c3   :  { %423 = vperm.xlu0 %1495, %v419_v36   ;;  %v159_v36 = vadd.f32 %v156_v35, %v1741_v20 }
 0x2c5   :  { %v363_v41 = vsub.f32 %v159_v36, %v1863_v7 }
 0x2c7   :  { %437 = vrot.lane.b32.xlu0 %v1702_v4, %s1656_s23 }
 0x2c8   :  { %1497 = vset.pattern.permute.xlu0 %v1646_v1 }
 0x32e   :  { %v382_v43 = vpop.permute.xlu0 %381 }
 0x32f   :  { %vm389_vm11 = vcmp.eq.f32.partialorder %v1719_v12, %v382_v43  ;;  %v216_v43 = vadd.f32 %v213_v38, %v1747_v23 }
 0x332   :  { %v387_v5 = vpop.permute.xlu0 %386  ;;  %v398_v46 = vpop.permute.xlu1 %397 }
 0x333   :  { %vm390_vm9 = vcmp.eq.f32.partialorder %v1719_v12, %v387_v5  ;;  %v405_v59 = vsel %vm389_vm11, %v398_v46, 0.0 }
 0x336   :  { %v403_v48 = vpop.permute.xlu0 %402  ;;  %v429_v53 = vpop.permute.xlu1 %428 }
 0x337   :  { %v406_v4 = vsel %vm390_vm9, %v403_v48, 0.0 }
 0x33a   :  { %v410_v51 = vpop.permute.xlu0 %409  ;;  %v440_v56 = vpop.permute.xlu1 %439 }
 0x33b   :  { %vm417_vm12 = vcmp.eq.f32.partialorder %v1719_v12, %v410_v51 }
 0x33e   :  { %v415_v54 = vpop.permute.xlu0 %414 }
 0x33f   :  { %vm418_vm10 = vcmp.eq.f32.partialorder %v1719_v12, %v415_v54 }
 0x340   :  { %v432_v55 = vsel %vm418_vm10, %v429_v53, 0.0 }
 0x341   :  { %v434_v57 = vadd.f32 %v432_v55, %v406_v4 }
 0x342   :  { %v424_v58 = vpop.permute.xlu0 %423 }
 0x343   :  { %v444_v60 = vmul.f32 %v440_v56, %v434_v57  ;;  %v431_v61 = vsel %vm417_vm12, %v424_v58, 0.0  ;;  %v119_v57 = vstv %s118_s5 }
 0x344   :  { %v433_v10 = vadd.f32 %v431_v61, %v405_v59  ;;  %1532 = vrcp.f32 %v119_v57 }
 0x345   :  { %v448_v11 = vsel %vm124_vm0, %v444_v60, 0.0  ;;  %1534 = vlog2.f32 %v1865_v8 }
 0x346   :  { %449 = vadd.xlane.f32.xlu1 %v448_v11  ;;  %v438_v16 = vpop.permute.xlu0 %437  ;;  %1536 = vlog2.f32 %v1838_v39 }
 0x347   :  { %v443_v17 = vmul.f32 %v438_v16, %v433_v10 }
 0x349   :  { %v445_v27 = vsel %vm124_vm0, %v443_v17, 0.0 }
 0x34a   :  { %446 = vadd.xlane.f32.xlu0 %v445_v27 }
 0x34e   :  { %v1533_v17 = vpop.eup %1532 }
 0x34f   :  { %v1535_v27 = vpop.eup %1534 }
 0x350   :  { %v1537_v44 = vpop.eup %1536 }
 0x351   :  { %v158_v33 = vmul.f32 0.6931472, %v1537_v44 }
 0x357   :  { %490 = vrot.lane.b32.xlu1 %v1892_v29, %s1647_s11 }
 0x35b   :  { %492 = vrot.lane.b32.xlu1 %v1899_v30, %s1647_s11 }
 0x360   :  { %510 = vperm.xlu0 %1497, %v1892_v29  }
 0x364   :  { %1500 = vset.pattern.permute.xlu0 %v1653_v13 }
 0x37f   :  { %109 = vadd.xlane.f32.xlu0 %v108_v47  ;;  %v215_v47 = vmul.f32 0.6931472, %v1535_v27 }
 0x381   :  { %v217_v38 = vadd.f32 %v215_v47, %v1745_v22 }
 0x3d3   :  { %v450_v32 = vpop.xlane.xlu1 %449 }
 0x3d7   :  { %v1911_v5 = vpop.permute.xlu1 %490  ;;  %v447_v18 = vpop.xlane.xlu0 %446 }
 0x3d8   :  { %v451_v46 = vsub.f32 %v216_v43, %v447_v18  ;;  %v496_v54 = vsel %vm27_vm4, %v1911_v5, 0.0  ;;  %v160_v43 = vadd.f32 %v158_v33, %v1743_v21  ;;  %v452_v18 = vsub.f32 %v217_v38, %v450_v32  ;;  %v1949_v21 = vld [vmem:[%s2400_s0 + $0x10] sm:$0xff]  ;;  %v1955_v32 = vld [vmem:[%s2400_s0 + $0x18] sm:$0xff] }
 0x3d9   :  { %v539_v22 = vand.u32 2147483647, %v1949_v21 }
 0x3da   :  { %v453_v48 = vadd.f32 %v451_v46, %v363_v41  ;;  %v364_v46 = vsub.f32 %v160_v43, %v1881_v45 }
 0x3db   :  { %v1914_v51 = vpop.permute.xlu1 %492  ;;  %v541_v45 = vsub.f32 0.0, %v539_v22 }
 0x3dc   :  { %v455_v53 = vmul.f32 %v453_v48, %v1680_v0  ;;  %v497_v4 = vsel %vm27_vm4, %v1914_v51, 0.0  ;;  %v454_v48 = vadd.f32 %v452_v18, %v364_v46  ;;  %v591_v46 = vsel %vm124_vm0, %v1949_v21, -inf }
 0x3dd   :  { %v498_v20 = vadd.f32 %v497_v4, %v496_v54  ;;  %v543_v54 = vmul.f32 1.442695, %v541_v45  ;;  %v540_v4 = vand.u32 2147483647, %v1955_v32 }
 0x3de   :  { %459 = vrot.lane.b32.xlu0 %v455_v53, %s1647_s11  ;;  %v456_v53 = vmul.f32 %v454_v48, %v1689_v2 }
 0x3df   :  { %499 = vadd.xlane.f32.xlu1 %v498_v20  ;;  %v511_v23 = vpop.permute.xlu0 %510  ;;  %1538 = vpow2.f32 %v543_v54  ;;  %v542_v20 = vsub.f32 0.0, %v540_v4 }
 0x3e0   :  { %vm517_vm14 = vcmp.eq.f32.partialorder %v1719_v12, %v511_v23 }
 0x3e1   :  { %v519_v7 = vsel %vm517_vm14, 1.0, %v1654_v37  ;;  %v545_v23 = vmul.f32 1.442695, %v542_v20  ;;  %v594_v20 = vsel %vm124_vm0, %v1955_v32, -inf }
 0x3e2   :  { %v521_v55 = vmul.f32 0.9, %v519_v7 }
 0x3e3   :  { %1540 = vpow2.f32 %v545_v23 }
 0x3e4   :  { %v523_v56 = vadd.f32 0.00125, %v521_v55 }
 0x3e9   :  { %v1539_v7 = vpop.eup %1538 }
 0x3ea   :  { %v547_v55 = vadd.f32 1.0, %v1539_v7 }
 0x3ec   :  { %1542 = vlog2.f32 %v547_v55 }
 0x3f0   :  { %514 = vperm.xlu1 %1498, %v1899_v30  }
 0x3f4   :  { %529 = vrot.lane.b32.xlu1 %v523_v56, %s1655_s22  ;;  %v1541_v56 = vpop.eup %1540 }
 0x3f5   :  { %1499 = vset.pattern.permute.xlu1 %v1648_v3  ;;  %v548_v57 = vadd.f32 1.0, %v1541_v56 }
 0x3f7   :  { %1544 = vlog2.f32 %v548_v57 }
 0x40c   :  { %v110_v58 = vpop.xlane.xlu0 %109 }
 0x40d   :  { %v111_v59 = vrot.slane %v110_v58, 4 }
 0x40f   :  { %v112_v60 = vadd.f32 %v111_v59, %v110_v58  ;;  %v525_v59 = vmax.f32 %v1949_v21, 0.0 }
 0x411   :  { %v113_v61 = vrot.slane %v112_v60, 2 }
 0x413   :  { %v114_v10 = vadd.f32 %v113_v61, %v112_v60  ;;  %v1543_v61 = vpop.eup %1542 }
 0x414   :  { %v1545_v47 = vpop.eup %1544 }
 0x415   :  { %v115_v11 = vrot.slane %v114_v10, 1  ;;  %v552_v38 = vmul.f32 0.6931472, %v1545_v47 }
 0x417   :  { %v116_v16 = vadd.f32 %v115_v11, %v114_v10  ;;  %v550_v11 = vmul.f32 0.6931472, %v1543_v61 }
 0x419   :  { %1440 = vpush %v116_v16 }
 0x41a   :  { %1442 = vpush %v1533_v17  ;;  %v526_v17 = vmax.f32 %v1955_v32, 0.0 }
 0x44a   :  { %s2067_s10 = spop %1440 }
 0x44b   :  { %s2069_s12 = spop %1442 }
 0x450   :  { %v1968_v48 = vpop.permute.xlu0 %459 }
 0x46c   :  { %v1933_v31 = vpop.xlane.xlu1 %499 }
 0x470   :  { %v515_v50 = vpop.permute.xlu1 %514 }
 0x471   :  { %vm518_vm15 = vcmp.eq.f32.partialorder %v1719_v12, %v515_v50 }
 0x472   :  { %v520_v35 = vsel %vm518_vm15, 1.0, %v1654_v37 }
 0x473   :  { %v522_v36 = vmul.f32 0.9, %v520_v35 }
 0x474   :  { %v530_v58 = vpop.permute.xlu1 %529 }
 0x475   :  { %v524_v41 = vadd.f32 0.00125, %v522_v36  ;;  %v535_v60 = vmul.f32 %v1949_v21, %v530_v58 }
 0x477   :  { %531 = vrot.lane.b32.xlu1 %v524_v41, %s1655_s22  ;;  %v537_v10 = vsub.f32 %v525_v59, %v535_v60  ;;  %v627_v60 = vsel %vm161_vm1, %v1949_v21, -inf }
 0x479   :  { %v553_v44 = vadd.f32 %v550_v11, %v537_v10 }
 0x47b   :  { %556 = vperm.xlu1 %1499, %v1892_v29  }
 0x47f   :  { %461 = vrot.lane.b32.xlu1 %v456_v53, %s1647_s11 }
 0x483   :  { %560 = vperm.xlu1 %1499, %v1899_v30  }
 0x487   :  { %1501 = vset.pattern.permute.xlu1 %v1659_v62 }
 0x4e9   :  { %v532_v16 = vpop.permute.xlu1 %531 }
 0x4ea   :  { %v536_v27 = vmul.f32 %v1955_v32, %v532_v16 }
 0x4ec   :  { %v538_v35 = vsub.f32 %v526_v17, %v536_v27 }
 0x4ee   :  { %v554_v43 = vadd.f32 %v552_v38, %v538_v35 }
 0x4fa   :  { %v557_v50 = vpop.permute.xlu1 %556 }
 0x4fb   :  { %v563_v33 = vmul.f32 %v557_v50, %v553_v44 }
 0x4fd   :  { %567 = vrot.lane.b32.xlu0 %v563_v33, %s1657_s24 }
 0x4fe   :  { %v1963_v36 = vpop.permute.xlu1 %461 }
 0x502   :  { %v561_v18 = vpop.permute.xlu1 %560 }
 0x503   :  { %v564_v41 = vmul.f32 %v561_v18, %v554_v43 }
 0x505   :  { %569 = vrot.lane.b32.xlu1 %v564_v41, %s1657_s24 }
 0x529   :  { %592 = vmax.xlane.f32.xlu1 %v591_v46 }
 0x56f   :  { %v568_v53 = vpop.permute.xlu0 %567 }
 0x570   :  { %v573_v45 = vsel %vm105_vm13, %v568_v53, 0.0 }
 0x577   :  { %v570_v22 = vpop.permute.xlu1 %569 }
 0x578   :  { %v574_v54 = vsel %vm105_vm13, %v570_v22, 0.0 }
 0x579   :  { %v575_v4 = vadd.f32 %v574_v54, %v573_v45 }
 0x57b   :  { %576 = vadd.xlane.f32.xlu0 %v575_v4 }
 0x57f   :  { %595 = vmax.xlane.f32.xlu0 %v594_v20 }
 0x5b6   :  { %v1974_v23 = vpop.xlane.xlu1 %592 }
 0x5b7   :  { %v597_v7 = vsub.f32 %v1949_v21, %v1974_v23 }
 0x5b9   :  { %v599_v55 = vmul.f32 1.442695, %v597_v7 }
 0x5bb   :  { %1546 = vpow2.f32 %v599_v55 }
 0x5bc   :  { %1548 = vrcp.f32 %v1865_v8 }
 0x5bd   :  { %1550 = vrcp.f32 %v1859_v63 }
 0x5be   :  { %1552 = vrcp.f32 %v1838_v39 }
 0x5bf   :  { %1554 = vrcp.f32 %v1877_v40 }
 0x5c5   :  { %v1547_v56 = vpop.eup %1546 }
 0x5c6   :  { %v603_v57 = vsel %vm124_vm0, %v1547_v56, 0.0  ;;  %v609_v58 = vmul.f32 %v1547_v56, %v1719_v12  ;;  %v1549_v61 = vpop.eup %1548 }
 0x5c7   :  { %604 = vadd.xlane.f32.xlu0 %v603_v57  ;;  %v1551_v10 = vpop.eup %1550  ;;  %v211_v16 = vmul.f32 %v1549_v61, %v1879_v42 }
 0x5c8   :  { %v611_v59 = vsel %vm124_vm0, %v609_v58, 0.0  ;;  %v1553_v11 = vpop.eup %1552  ;;  %v152_v47 = vmul.f32 %v1551_v10, %v1861_v6 }
 0x5c9   :  { %612 = vadd.xlane.f32.xlu1 %v611_v59  ;;  %v1555_v17 = vpop.eup %1554  ;;  %v154_v27 = vmul.f32 %v1553_v11, %v1841_v19  ;;  %v221_v8 = vadd.f32 %v211_v16, %v1689_v2  ;;  %v630_v59 = vsel %vm161_vm1, %v1955_v32, -inf }
 0x5ca   :  { %v209_v44 = vmul.f32 %v1555_v17, %v1867_v9  ;;  %v218_v40 = vsub.f32 %v1680_v0, %v152_v47 }
 0x5cb   :  { %v219_v63 = vsub.f32 %v1689_v2, %v154_v27  ;;  %v229_v50 = vmin.f32 %v221_v8, %v1749_v24 }
 0x5cc   :  { %v220_v39 = vadd.f32 %v209_v44, %v1680_v0  ;;  %v236_v19 = vmax.f32 %v218_v40, %v1765_v34 }
 0x5cd   :  { %628 = vmax.xlane.f32.xlu1 %v627_v60  ;;  %v237_v33 = vmax.f32 %v219_v63, %v1753_v26  ;;  %v243_v38 = vsub.f32 %v221_v8, %v219_v63 }
 0x5ce   :  { %v228_v42 = vmin.f32 %v220_v39, %v1757_v28  ;;  %v242_v6 = vsub.f32 %v220_v39, %v218_v40 }
 0x5cf   :  { %v239_v35 = vsub.f32 %v229_v50, %v237_v33  ;;  %v261_v2 = vadd.f32 %v1821_v52, %v243_v38  ;;  %v286_v50 = vstv %s1928_s4 }
 0x5d0   :  { %v238_v9 = vsub.f32 %v228_v42, %v236_v19  ;;  %v260_v41 = vadd.f32 %v1819_v49, %v242_v6 }
 0x5d1   :  { %v241_v43 = vmax.f32 %v239_v35, 0.0 }
 0x5d2   :  { %v240_v18 = vmax.f32 %v238_v9, 0.0 }
 0x5d3   :  { %v263_v46 = vsub.f32 %v261_v2, %v241_v43 }
 0x5d4   :  { %v262_v0 = vsub.f32 %v260_v41, %v240_v18 }
 0x5d5   :  { %v265_v53 = vadd.f32 1e-07, %v263_v46 }
 0x5d6   :  { %v264_v26 = vadd.f32 1e-07, %v262_v0 }
 0x5d7   :  { %1556 = vrcp.f32 %v265_v53  ;;  %v466_v53 = vsel %vm27_vm4, %v1963_v36, 0.0  ;;  %v501_v36 = vrot.slane %v1933_v31, 4 }
 0x5d8   :  { %1558 = vrcp.f32 %v264_v26 }
 0x5e1   :  { %v1557_v45 = vpop.eup %1556 }
 0x5e2   :  { %v1559_v54 = vpop.eup %1558  ;;  %v269_v52 = vmul.f32 %v1557_v45, %v241_v43 }
 0x5e3   :  { %v267_v4 = vmul.f32 %v1559_v54, %v240_v18 }
 0x5e4   :  { %v271_v55 = vsub.f32 1.0, %v269_v52 }
 0x5e5   :  { %v270_v56 = vsub.f32 1.0, %v267_v4 }
 0x5e6   :  { %v273_v58 = vmul.f32 %v271_v55, %v1735_v15 }
 0x5e7   :  { %v272_v60 = vmul.f32 %v270_v56, %v1733_v14 }
 0x5e8   :  { %v275_v61 = vsel %vm27_vm4, %v273_v58, 0.0 }
 0x5e9   :  { %v274_v10 = vsel %vm27_vm4, %v272_v60, 0.0 }
 0x5ea   :  { %v276_v11 = vadd.f32 %v275_v61, %v274_v10 }
 0x608   :  { %v2001_v24 = vpop.xlane.xlu0 %576 }
 0x60c   :  { %v2003_v28 = vpop.xlane.xlu0 %595 }
 0x60d   :  { %v598_v34 = vsub.f32 %v1955_v32, %v2003_v28 }
 0x60f   :  { %v601_v22 = vmul.f32 1.442695, %v598_v34  ;;  %v465_v34 = vsel %vm27_vm4, %v1968_v48, 0.0  ;;  %v578_v48 = vrot.slane %v2001_v24, 4 }
 0x611   :  { %1560 = vpow2.f32 %v601_v22  ;;  %v467_v22 = vadd.f32 %v466_v53, %v465_v34 }
 0x61b   :  { %v1561_v49 = vpop.eup %1560 }
 0x61c   :  { %v606_v20 = vsel %vm124_vm0, %v1561_v49, 0.0  ;;  %v610_v7 = vmul.f32 %v1561_v49, %v1719_v12  ;;  %v502_v49 = vadd.f32 %v501_v36, %v1933_v31 }
 0x61d   :  { %607 = vadd.xlane.f32.xlu0 %v606_v20 }
 0x61e   :  { %v614_v57 = vsel %vm124_vm0, %v610_v7, 0.0  ;;  %v579_v7 = vadd.f32 %v578_v48, %v2001_v24  ;;  %v503_v56 = vrot.slane %v502_v49, 2 }
 0x620   :  { %v580_v58 = vrot.slane %v579_v7, 2  ;;  %v504_v61 = vadd.f32 %v503_v56, %v502_v49 }
 0x621   :  { %615 = vadd.xlane.f32.xlu0 %v614_v57 }
 0x625   :  { %631 = vmax.xlane.f32.xlu0 %v630_v59 }
 0x629   :  { %277 = vadd.xlane.f32.xlu0 %v276_v11 }
 0x654   :  { %v2023_v14 = vpop.xlane.xlu0 %604 }
 0x656   :  { %v2016_v16 = vpop.xlane.xlu1 %612 }
 0x65a   :  { %v2018_v17 = vpop.xlane.xlu1 %628 }
 0x65b   :  { %v633_v15 = vsub.f32 %v1949_v21, %v2018_v17 }
 0x65d   :  { %v635_v27 = vmul.f32 1.442695, %v633_v15  ;;  %v581_v15 = vadd.f32 %v580_v58, %v579_v7 }
 0x65f   :  { %1562 = vpow2.f32 %v635_v27  ;;  %v582_v31 = vrot.slane %v581_v15, 1 }
 0x661   :  { %v583_v24 = vadd.f32 %v582_v31, %v581_v15 }
 0x669   :  { %v1563_v44 = vpop.eup %1562 }
 0x66a   :  { %641 = vrot.lane.b32.xlu1 %v1563_v44, %s1656_s23  ;;  %v653_v46 = vmul.f32 %v1563_v44, %v1751_v25  ;;  %v505_v44 = vrot.slane %v504_v61, 1 }
 0x6aa   :  { %v2025_v47 = vpop.xlane.xlu0 %607 }
 0x6ae   :  { %v2027_v8 = vpop.xlane.xlu0 %615 }
 0x6b2   :  { %v2029_v63 = vpop.xlane.xlu0 %631 }
 0x6b3   :  { %v634_v39 = vsub.f32 %v1955_v32, %v2029_v63 }
 0x6b5   :  { %v637_v40 = vmul.f32 1.442695, %v634_v39 }
 0x6b6   :  { %v278_v33 = vpop.xlane.xlu0 %277 }
 0x6b7   :  { %1564 = vpow2.f32 %v637_v40  ;;  %v279_v42 = vrot.slane %v278_v33, 4 }
 0x6b8   :  { %1566 = vrcp.f32 %v286_v50  ;;  %v506_v50 = vadd.f32 %v505_v44, %v504_v61 }
 0x6b9   :  { %v280_v19 = vadd.f32 %v279_v42, %v278_v33 }
 0x6bb   :  { %v281_v35 = vrot.slane %v280_v19, 2 }
 0x6bd   :  { %v282_v9 = vadd.f32 %v281_v35, %v280_v19 }
 0x6bf   :  { %v283_v38 = vrot.slane %v282_v9, 1 }
 0x6c1   :  { %v1565_v6 = vpop.eup %1564  ;;  %v284_v43 = vadd.f32 %v283_v38, %v282_v9 }
 0x6c2   :  { %643 = vrot.lane.b32.xlu0 %v1565_v6, %s1656_s23  ;;  %v1567_v18 = vpop.eup %1566  ;;  %v654_v45 = vmul.f32 %v1565_v6, %v1751_v25 }
 0x6c3   :  { %1444 = vpush %v284_v43 }
 0x6c4   :  { %1446 = vpush %v1567_v18 }
 0x6dc   :  { %v642_v2 = vpop.permute.xlu1 %641 }
 0x6dd   :  { %v647_v41 = vsel %vm124_vm0, %v642_v2, 0.0 }
 0x6de   :  { %648 = vadd.xlane.f32.xlu1 %v647_v41 }
 0x6ef   :  { %657 = vrot.lane.b32.xlu1 %v653_v46, %s1656_s23 }
 0x6f4   :  { %s2071_s13 = spop %1444 }
 0x6f5   :  { %s2073_s14 = spop %1446 }
 0x6f6   :  { %s289_s9 = smul.f32 %s2073_s14, %s2071_s13 }
 0x734   :  { %v644_v0 = vpop.permute.xlu0 %643 }
 0x735   :  { %v650_v26 = vsel %vm124_vm0, %v644_v0, 0.0 }
 0x736   :  { %651 = vadd.xlane.f32.xlu0 %v650_v26 }
 0x73a   :  { %468 = vadd.xlane.f32.xlu0 %v467_v22 }
 0x750   :  { %659 = vrot.lane.b32.xlu0 %v654_v45, %s1656_s23 }
 0x76b   :  { %v2045_v54 = vpop.xlane.xlu1 %648 }
 0x76f   :  { %v658_v52 = vpop.permute.xlu1 %657 }
 0x770   :  { %v663_v4 = vsel %vm124_vm0, %v658_v52, 0.0 }
 0x771   :  { %664 = vadd.xlane.f32.xlu1 %v663_v4 }
 0x782   :  { %683 = vrot.lane.b32.xlu1 %v1892_v29, %s1649_s18 }
 0x786   :  { %691 = vrot.lane.b32.xlu1 %v1892_v29, %s1650_s19 }
 0x78a   :  { %693 = vrot.lane.b32.xlu1 %v1899_v30, %s1650_s19 }
 0x78e   :  { %705 = vrot.lane.b32.xlu1 %v1892_v29, %s1652_s21 }
 0x7c3   :  { %v2059_v20 = vpop.xlane.xlu0 %651 }
 0x7c7   :  { %v469_v55 = vpop.xlane.xlu0 %468 }
 0x7c8   :  { %v470_v57 = vrot.slane %v469_v55, 4 }
 0x7ca   :  { %v471_v59 = vadd.f32 %v470_v57, %v469_v55 }
 0x7cb   :  { %v660_v60 = vpop.permute.xlu0 %659 }
 0x7cc   :  { %v472_v10 = vrot.slane %v471_v59, 2  ;;  %v666_v11 = vsel %vm124_vm0, %v660_v60, 0.0 }
 0x7cd   :  { %667 = vadd.xlane.f32.xlu0 %v666_v11 }
 0x7ce   :  { %v473_v27 = vadd.f32 %v472_v10, %v471_v59 }
 0x7d0   :  { %v474_v39 = vrot.slane %v473_v27, 1 }
 0x7d2   :  { %v475_v40 = vadd.f32 %v474_v39, %v473_v27 }
 0x7d4   :  { %1448 = vpush %v475_v40 }
 0x7d5   :  { %1450 = vpush %v506_v50 }
 0x7d6   :  { %1452 = vpush %v583_v24 }
 0x7e3   :  { %685 = vrot.lane.b32.xlu0 %v1899_v30, %s1649_s18 }
 0x7e7   :  { %707 = vrot.lane.b32.xlu0 %v1899_v30, %s1652_s21 }
 0x7fe   :  { %v665_v33 = vpop.xlane.xlu1 %664 }
 0x802   :  { %v684_v42 = vpop.permute.xlu1 %683 }
 0x805   :  { %s2075_s15 = spop %1448 }
 0x806   :  { %s1451_s16 = spop %1450  ;;  %v692_v19 = vpop.permute.xlu1 %691 }
 0x807   :  { %s2078_s17 = smax.f32 %s1660_s3, %s1451_s16  ;;  %v752_v41 = vsub.f32 %v1892_v29, %v692_v19  ;;  %s2152_s5 = spop %1452 }
 0x808   :  { %s585_s20 = smul.f32 80.0, %s2078_s17 }
 0x809   :  { %v754_v26 = vmax.f32 %v752_v41, 0.0 }
 0x80a   :  { %v586_v35 = vstv %s585_s20  ;;  %v694_v9 = vpop.permute.xlu1 %693 }
 0x80b   :  { %1568 = vrcp.f32 %v586_v35  ;;  %v753_v34 = vsub.f32 %v1899_v30, %v694_v9  ;;  %v756_v52 = vmin.f32 %v754_v26, 14.99 }
 0x80c   :  { %1570 = vrcp.f32 %v2059_v20 }
 0x80d   :  { %v755_v4 = vmax.f32 %v753_v34, 0.0  ;;  %v758_v49 = vfloor.f32 %v756_v52  ;;  %1572 = vrcp.f32 %v2023_v14 }
 0x80e   :  { %v706_v38 = vpop.permute.xlu1 %705  ;;  %1574 = vrcp.f32 %v2045_v54 }
 0x80f   :  { %v711_v6 = vsub.f32 %v1892_v29, %v706_v38  ;;  %v2089_v48 = vmin.f32 %v755_v4, 14.99  ;;  %v772_v7 = vadd.f32 1.0, %v758_v49  ;;  %v800_v59 = vsub.f32 %v756_v52, %v758_v49 }
 0x810   :  { %1576 = vrcp.f32 %v2025_v47 }
 0x811   :  { %715 = vrot.lane.b32.xlu1 %v711_v6, %s1649_s18  ;;  %v2092_v55 = vfloor.f32 %v2089_v48  ;;  %v774_v56 = vsub.f32 %v772_v7, %v756_v52 }
 0x813   :  { %v773_v57 = vadd.f32 1.0, %v2092_v55 }
 0x815   :  { %v1569_v43 = vpop.eup %1568  ;;  %v775_v58 = vsub.f32 %v773_v57, %v2089_v48 }
 0x816   :  { %1454 = vpush %v1569_v43  ;;  %v1571_v18 = vpop.eup %1570 }
 0x817   :  { %v1573_v60 = vpop.eup %1572 }
 0x818   :  { %v1575_v61 = vpop.eup %1574  ;;  %v618_v10 = vmul.f32 %v1573_v60, %v2016_v16 }
 0x819   :  { %v670_v11 = vmul.f32 %v1575_v61, %v665_v33 }
 0x81a   :  { %v679_v15 = vsub.f32 %v1892_v29, %v618_v10  ;;  %v1577_v24 = vpop.eup %1576 }
 0x81b   :  { %v681_v27 = vadd.f32 %v1892_v29, %v670_v11  ;;  %v620_v38 = vmul.f32 %v1577_v24, %v2027_v8 }
 0x81c   :  { %v697_v44 = vmax.f32 %v679_v15, %v692_v19 }
 0x81d   :  { %v689_v39 = vmin.f32 %v681_v27, %v684_v42  ;;  %v703_v50 = vsub.f32 %v681_v27, %v679_v15  ;;  %v680_v16 = vsub.f32 %v1899_v30, %v620_v38 }
 0x81f   :  { %v699_v40 = vsub.f32 %v689_v39, %v697_v44  ;;  %v698_v33 = vmax.f32 %v680_v16, %v694_v9  ;;  %v801_v39 = vsub.f32 %v2089_v48, %v2092_v55 }
 0x821   :  { %v701_v6 = vmax.f32 %v699_v40, 0.0  ;;  %v2132_v40 = vld [vmem:[%s2400_s0 + $0x28] sm:$0xff] }
 0x822   :  { %v1055_v48 = vsel %vm124_vm0, %v2132_v40, -inf }
 0x847   :  { %s2154_s6 = spop %1454 }
 0x85a   :  { %v668_v2 = vpop.xlane.xlu0 %667 }
 0x85b   :  { %v672_v46 = vmul.f32 %v1571_v18, %v668_v2 }
 0x85d   :  { %v682_v0 = vadd.f32 %v1899_v30, %v672_v46 }
 0x85e   :  { %v686_v53 = vpop.permute.xlu0 %685 }
 0x85f   :  { %v690_v22 = vmin.f32 %v682_v0, %v686_v53  ;;  %v704_v41 = vsub.f32 %v682_v0, %v680_v16 }
 0x861   :  { %v700_v2 = vsub.f32 %v690_v22, %v698_v33 }
 0x862   :  { %v708_v45 = vpop.permute.xlu0 %707 }
 0x863   :  { %v712_v36 = vsub.f32 %v1899_v30, %v708_v45  ;;  %v702_v53 = vmax.f32 %v700_v2, 0.0 }
 0x865   :  { %717 = vrot.lane.b32.xlu0 %v712_v36, %s1649_s18 }
 0x869   :  { %762 = vperm.xlu0 %1500, %v758_v49  }
 0x86d   :  { %767 = vperm.xlu0 %1500, %v2092_v55   ;;  %v747_v55 = vstv %s2078_s17 }
 0x871   :  { %778 = vperm.xlu0 %1500, %v774_v56  }
 0x875   :  { %783 = vperm.xlu0 %1500, %v775_v58  }
 0x879   :  { %790 = vperm.xlu0 %1500, %v772_v7  }
 0x87d   :  { %795 = vperm.xlu0 %1500, %v773_v57  }
 0x881   :  { %804 = vperm.xlu0 %1500, %v800_v59  }
 0x883   :  { %v716_v31 = vpop.permute.xlu1 %715 }
 0x884   :  { %v721_v35 = vadd.f32 %v716_v31, %v703_v50  ;;  %v2123_v31 = vld [vmem:[%s2401_s1 + $0x20] sm:$0xff] }
 0x885   :  { %826 = vrot.lane.b32.xlu0 %v1892_v29, %s1658_s25 }
 0x886   :  { %v723_v43 = vsub.f32 %v721_v35, %v701_v6 }
 0x888   :  { %v725_v18 = vadd.f32 1e-07, %v723_v43 }
 0x88a   :  { %1578 = vrcp.f32 %v725_v18 }
 0x894   :  { %v1579_v34 = vpop.eup %1578 }
 0x895   :  { %v728_v45 = vmul.f32 %v1579_v34, %v701_v6 }
 0x897   :  { %v731_v52 = vsub.f32 1.0, %v728_v45  ;;  %v1091_v45 = vsel %vm161_vm1, %v2132_v40, -inf }
 0x899   :  { %v733_v7 = vmul.f32 %v731_v52, %v1911_v5 }
 0x89b   :  { %v735_v0 = vsel %vm27_vm4, %v733_v7, 0.0 }
 0x8d7   :  { %v718_v46 = vpop.permute.xlu0 %717 }
 0x8d8   :  { %v722_v19 = vadd.f32 %v718_v46, %v704_v41 }
 0x8da   :  { %v724_v42 = vsub.f32 %v722_v19, %v702_v53 }
 0x8dc   :  { %v726_v26 = vadd.f32 1e-07, %v724_v42  ;;  %v2144_v42 = vld [vmem:[%s2400_s0 + $0x20] sm:$0xff] }
 0x8dd   :  { %v1088_v34 = vsel %vm161_vm1, %v2144_v42, -inf }
 0x8de   :  { %1580 = vrcp.f32 %v726_v26 }
 0x8df   :  { %1582 = vrcp.f32 %v747_v55 }
 0x8e8   :  { %v1581_v4 = vpop.eup %1580  ;;  %v763_v8 = vpop.permute.xlu0 %762 }
 0x8e9   :  { %v730_v36 = vmul.f32 %v1581_v4, %v702_v53  ;;  %vm770_vm3 = vcmp.eq.f32.partialorder %v1719_v12, %v763_v8  ;;  %v1583_v33 = vpop.eup %1582 }
 0x8eb   :  { %v732_v49 = vsub.f32 1.0, %v730_v36 }
 0x8ec   :  { %v768_v9 = vpop.permute.xlu0 %767 }
 0x8ed   :  { %v734_v22 = vmul.f32 %v732_v49, %v1914_v51  ;;  %vm771_vm2 = vcmp.eq.f32.partialorder %v1719_v12, %v768_v9  ;;  %v1052_v9 = vsel %vm124_vm0, %v2144_v42, -inf }
 0x8ef   :  { %v736_v56 = vsel %vm27_vm4, %v734_v22, 0.0 }
 0x8f0   :  { %v779_v57 = vpop.permute.xlu0 %778  ;;  %v737_v58 = vadd.f32 %v736_v56, %v735_v0 }
 0x8f1   :  { %v786_v51 = vsel %vm770_vm3, %v779_v57, 0.0 }
 0x8f2   :  { %738 = vadd.xlane.f32.xlu1 %v737_v58 }
 0x8f4   :  { %v784_v59 = vpop.permute.xlu0 %783 }
 0x8f5   :  { %v787_v60 = vsel %vm771_vm2, %v784_v59, 0.0 }
 0x8f8   :  { %v791_v61 = vpop.permute.xlu0 %790 }
 0x8f9   :  { %vm798_vm5 = vcmp.eq.f32.partialorder %v1719_v12, %v791_v61 }
 0x8fc   :  { %v796_v10 = vpop.permute.xlu0 %795 }
 0x8fd   :  { %vm799_vm6 = vcmp.eq.f32.partialorder %v1719_v12, %v796_v10 }
 0x900   :  { %v805_v5 = vpop.permute.xlu0 %804 }
 0x901   :  { %v812_v11 = vsel %vm798_vm5, %v805_v5, 0.0 }
 0x902   :  { %v814_v15 = vadd.f32 %v812_v11, %v786_v51 }
 0x903   :  { %828 = vrot.lane.b32.xlu1 %v1899_v30, %s1658_s25 }
 0x904   :  { %v816_v27 = vmul.f32 %v1949_v21, %v814_v15  ;;  %v827_v18 = vpop.permute.xlu0 %826 }
 0x905   :  { %v832_v52 = vsub.f32 %v1892_v29, %v827_v18 }
 0x906   :  { %v818_v44 = vsel %vm124_vm0, %v816_v27, 0.0 }
 0x907   :  { %819 = vadd.xlane.f32.xlu0 %v818_v44  ;;  %v834_v4 = vmax.f32 %v832_v52, 0.0 }
 0x909   :  { %v836_v8 = vmin.f32 %v834_v4, 14.99 }
 0x90b   :  { %v838_v29 = vfloor.f32 %v836_v8 }
 0x90d   :  { %v852_v36 = vadd.f32 1.0, %v838_v29  ;;  %v880_v7 = vsub.f32 %v836_v8, %v838_v29 }
 0x90f   :  { %v854_v49 = vsub.f32 %v852_v36, %v836_v8 }
 0x91d   :  { %809 = vperm.xlu0 %1500, %v801_v39  }
 0x921   :  { %1287 = vrot.lane.b32.xlu0 %v2123_v31, %s1658_s25 }
 0x925   :  { %900 = vrot.lane.b32.xlu0 %v1955_v32, %s1656_s23 }
 0x944   :  { %1056 = vmax.xlane.f32.xlu0 %v1055_v48 }
 0x97f   :  { %v739_v50 = vpop.xlane.xlu1 %738 }
 0x980   :  { %v740_v24 = vrot.slane %v739_v50, 4 }
 0x982   :  { %v741_v35 = vadd.f32 %v740_v24, %v739_v50 }
 0x983   :  { %v829_v22 = vpop.permute.xlu1 %828 }
 0x984   :  { %v742_v38 = vrot.slane %v741_v35, 2  ;;  %v833_v24 = vsub.f32 %v1899_v30, %v829_v22 }
 0x986   :  { %v743_v6 = vadd.f32 %v742_v38, %v741_v35  ;;  %v835_v18 = vmax.f32 %v833_v24, 0.0 }
 0x988   :  { %v744_v43 = vrot.slane %v743_v6, 1 }
 0x98a   :  { %v745_v16 = vadd.f32 %v744_v43, %v743_v6 }
 0x98c   :  { %1456 = vpush %v745_v16 }
 0x98d   :  { %1458 = vpush %v1583_v33 }
 0x994   :  { %v2137_v2 = vpop.xlane.xlu0 %819 }
 0x99c   :  { %v810_v41 = vpop.permute.xlu0 %809 }
 0x99d   :  { %v813_v46 = vsel %vm799_vm6, %v810_v41, 0.0 }
 0x99e   :  { %v815_v53 = vadd.f32 %v813_v46, %v787_v60 }
 0x9a0   :  { %v817_v19 = vmul.f32 %v1955_v32, %v815_v53  ;;  %v2161_v32 = vld [vmem:[%s2401_s1 + $0x28] sm:$0xff]  ;;  %v1288_v48 = vpop.permute.xlu0 %1287 }
 0x9a1   :  { %v1293_v43 = vsub.f32 %v2123_v31, %v1288_v48 }
 0x9a2   :  { %v821_v26 = vsel %vm124_vm0, %v817_v19, 0.0  ;;  %v837_v19 = vmin.f32 %v835_v18, 14.99 }
 0x9a3   :  { %822 = vadd.xlane.f32.xlu1 %v821_v26  ;;  %v1295_v46 = vmax.f32 %v1293_v43, 0.0 }
 0x9a5   :  { %v1297_v26 = vmin.f32 %v1295_v46, 14.99 }
 0x9a7   :  { %1089 = vmax.xlane.f32.xlu1 %v1088_v34  ;;  %v839_v34 = vfloor.f32 %v837_v19  ;;  %v1299_v52 = vfloor.f32 %v1297_v26 }
 0x9a9   :  { %v853_v4 = vadd.f32 1.0, %v839_v34  ;;  %v1313_v8 = vadd.f32 1.0, %v1299_v52 }
 0x9ab   :  { %1092 = vmax.xlane.f32.xlu1 %v1091_v45 }
 0x9bc   :  { %1152 = vrot.lane.b32.xlu1 %v2123_v31, %s1650_s19 }
 0x9bd   :  { %s1457_s0 = spop %1456 }
 0x9be   :  { %s2165_s16 = spop %1458 }
 0x9bf   :  { %s750_s17 = smul.f32 %s2165_s16, %s1457_s0 }
 0x9c0   :  { %1154 = vrot.lane.b32.xlu1 %v2161_v32, %s1650_s19 }
 0x9c1   :  { %s2170_s20 = sadd.f32 %s750_s17, %s289_s9 }
 0x9c4   :  { %1289 = vrot.lane.b32.xlu1 %v2161_v32, %s1658_s25  ;;  %s1634_s25 = scalar_lea.hbm %s2402_s2, 16 }
 0x9c5   :  { %p1635_p0 = scmp.ne.s32.totalorder %s2402_s2, %s1634_s25  ;;  %p1638_p1 = scmp.lt.u32.totalorder %s1634_s25, %s2402_s2 }
 0x9c7   :  { %p1640_p2 = pnand %p1638_p1, %p1635_p0 }
 0x9c8   :  { %870 = vperm.xlu1 %1501, %v852_v36   ;;  %v855_v36 = vsub.f32 %v853_v4, %v837_v19 }
 0x9cc   :  { %858 = vperm.xlu1 %1501, %v854_v49   ;;  %v881_v49 = vsub.f32 %v837_v19, %v839_v34 }
 0x9d0   :  { %884 = vperm.xlu1 %1501, %v880_v7  }
 0x9d4   :  { %898 = vrot.lane.b32.xlu1 %v1949_v21, %s1656_s23 }
 0x9d5   :  { %1502 = vset.pattern.permute.xlu1 %v1653_v13 }
 0x9f8   :  { %1053 = vmax.xlane.f32.xlu1 %v1052_v9 }
 0xa30   :  { %v2179_v0 = vpop.xlane.xlu1 %822 }
 0xa34   :  { %v2181_v56 = vpop.xlane.xlu1 %1089 }
 0xa35   :  { %v1094_v57 = vsub.f32 %v2144_v42, %v2181_v56 }
 0xa37   :  { %v1096_v58 = vmul.f32 1.442695, %v1094_v57  ;;  %v1315_v57 = vsub.f32 %v1313_v8, %v1297_v26 }
 0xa38   :  { %v2185_v59 = vpop.xlane.xlu1 %1092 }
 0xa39   :  { %1584 = vpow2.f32 %v1096_v58  ;;  %v1095_v21 = vsub.f32 %v2132_v40, %v2185_v59 }
 0xa3b   :  { %v1098_v60 = vmul.f32 1.442695, %v1095_v21 }
 0xa3c   :  { %v2189_v61 = vpop.permute.xlu1 %1152 }
 0xa3d   :  { %1586 = vpow2.f32 %v1098_v60  ;;  %v1213_v10 = vsub.f32 %v2123_v31, %v2189_v61  ;;  %v1341_v60 = vsub.f32 %v1297_v26, %v1299_v52 }
 0xa3f   :  { %v1215_v11 = vmax.f32 %v1213_v10, 0.0 }
 0xa40   :  { %v2193_v5 = vpop.permute.xlu1 %1154 }
 0xa41   :  { %v1214_v51 = vsub.f32 %v2161_v32, %v2193_v5  ;;  %v1217_v39 = vmin.f32 %v1215_v11, 14.99 }
 0xa43   :  { %v2197_v15 = vpop.eup %1584  ;;  %v1216_v27 = vmax.f32 %v1214_v51, 0.0  ;;  %v1219_v16 = vfloor.f32 %v1217_v39 }
 0xa44   :  { %1102 = vrot.lane.b32.xlu0 %v2197_v15, %s1656_s23  ;;  %v1290_v35 = vpop.permute.xlu1 %1289 }
 0xa45   :  { %v1218_v44 = vmin.f32 %v1216_v27, 14.99  ;;  %v1294_v6 = vsub.f32 %v2161_v32, %v1290_v35  ;;  %v1233_v53 = vadd.f32 1.0, %v1219_v16 }
 0xa47   :  { %v2201_v55 = vpop.eup %1586  ;;  %v1220_v50 = vfloor.f32 %v1218_v44  ;;  %v1296_v41 = vmax.f32 %v1294_v6, 0.0  ;;  %v1235_v7 = vsub.f32 %v1233_v53, %v1217_v39 }
 0xa48   :  { %1104 = vrot.lane.b32.xlu1 %v2201_v55, %s1656_s23  ;;  %v871_v51 = vpop.permute.xlu1 %870 }
 0xa49   :  { %v1234_v38 = vadd.f32 1.0, %v1220_v50  ;;  %1228 = vperm.xlu0 %1500, %v1220_v50   ;;  %v1298_v30 = vmin.f32 %v1296_v41, 14.99  ;;  %v1262_v22 = vsub.f32 %v1218_v44, %v1220_v50  ;;  %vm878_vm7 = vcmp.eq.f32.partialorder %v1719_v12, %v871_v51 }
 0xa4b   :  { %v1236_v33 = vsub.f32 %v1234_v38, %v1218_v44  ;;  %v1300_v45 = vfloor.f32 %v1298_v30 }
 0xa4c   :  { %1223 = vperm.xlu1 %1502, %v1219_v16   ;;  %v859_v44 = vpop.permute.xlu1 %858 }
 0xa4d   :  { %1244 = vperm.xlu0 %1500, %v1236_v33   ;;  %v1314_v9 = vadd.f32 1.0, %v1300_v45  ;;  %v1342_v21 = vsub.f32 %v1298_v30, %v1300_v45 }
 0xa4f   :  { %v1316_v58 = vsub.f32 %v1314_v9, %v1298_v30 }
 0xa50   :  { %1251 = vperm.xlu1 %1502, %v1233_v53   ;;  %v885_v50 = vpop.permute.xlu1 %884 }
 0xa51   :  { %1505 = vset.pattern.permute.xlu0 %v1659_v62  ;;  %v892_v35 = vsel %vm878_vm7, %v885_v50, 0.0 }
 0xa52   :  { %842 = vperm.xlu0 %1505, %v838_v29   ;;  %v1261_v29 = vsub.f32 %v1217_v39, %v1219_v16 }
 0xa54   :  { %1256 = vperm.xlu1 %1502, %v1234_v38   ;;  %v899_v6 = vpop.permute.xlu1 %898 }
 0xa56   :  { %847 = vperm.xlu0 %1505, %v839_v34  }
 0xa58   :  { %1503 = vset.pattern.permute.xlu1 %v1659_v62 }
 0xa59   :  { %1308 = vperm.xlu1 %1503, %v1300_v45   ;;  %v1114_v45 = vmul.f32 %v2197_v15, %v1751_v25 }
 0xa5a   :  { %875 = vperm.xlu0 %1505, %v853_v4  }
 0xa5d   :  { %1331 = vperm.xlu1 %1503, %v1313_v8  }
 0xa5e   :  { %863 = vperm.xlu0 %1505, %v855_v36  }
 0xa61   :  { %1504 = vset.pattern.permute.xlu1 %v1653_v13  ;;  %v901_v13 = vpop.permute.xlu0 %900 }
 0xa62   :  { %889 = vperm.xlu0 %1505, %v881_v49   ;;  %1239 = vperm.xlu1 %1504, %v1235_v7  }
 0xa65   :  { %v2214_v10 = vpop.xlane.xlu0 %1056 }
 0xa66   :  { %1303 = vperm.xlu0 %1505, %v1299_v52   ;;  %1265 = vperm.xlu1 %1504, %v1261_v29   ;;  %v1115_v52 = vmul.f32 %v2201_v55, %v1751_v25  ;;  %v1059_v4 = vsub.f32 %v2132_v40, %v2214_v10 }
 0xa68   :  { %v1062_v15 = vmul.f32 1.442695, %v1059_v4 }
 0xa6a   :  { %1336 = vperm.xlu0 %1505, %v1314_v9   ;;  %1270 = vperm.xlu1 %1504, %v1262_v22   ;;  %1588 = vpow2.f32 %v1062_v15 }
 0xa6e   :  { %1506 = vset.pattern.permute.xlu1 %v1659_v62  ;;  %1319 = vperm.xlu0 %1505, %v1315_v57  }
 0xa6f   :  { %1324 = vperm.xlu1 %1506, %v1316_v58  }
 0xa72   :  { %1350 = vperm.xlu0 %1505, %v1342_v21  }
 0xa73   :  { %1345 = vperm.xlu1 %1506, %v1341_v60  }
 0xa74   :  { %v2245_v7 = vpop.eup %1588 }
 0xa76   :  { %1507 = vset.pattern.permute.xlu0 %v1646_v1 }
 0xa77   :  { %1508 = vset.pattern.permute.xlu1 %v1646_v1 }
 0xa85   :  { %v2241_v8 = vpop.xlane.xlu1 %1053 }
 0xa86   :  { %v1058_v36 = vsub.f32 %v2144_v42, %v2241_v8 }
 0xa88   :  { %v1060_v49 = vmul.f32 1.442695, %v1058_v36 }
 0xa8a   :  { %1590 = vpow2.f32 %v1060_v49 }
 0xa8b   :  { %1592 = vlog2.f32 %v2025_v47 }
 0xa8c   :  { %1594 = vlog2.f32 %v2059_v20 }
 0xa8d   :  { %1596 = vlog2.f32 %v2045_v54 }
 0xa8e   :  { %1598 = vlog2.f32 %v2023_v14 }
 0xa94   :  { %v2247_v25 = vpop.eup %1590 }
 0xa95   :  { %v1064_v29 = vsel %vm124_vm0, %v2247_v25, 0.0 }
 0xab6   :  { %v1103_v11 = vpop.permute.xlu0 %1102 }
 0xab7   :  { %v1108_v57 = vsel %vm124_vm0, %v1103_v11, 0.0 }
 0xaba   :  { %v1105_v55 = vpop.permute.xlu1 %1104 }
 0xabb   :  { %v1111_v22 = vsel %vm124_vm0, %v1105_v55, 0.0 }
 0xac8   :  { %v1229_v27 = vpop.permute.xlu0 %1228 }
 0xac9   :  { %vm1232_vm1 = vcmp.eq.f32.partialorder %v1719_v12, %v1229_v27 }
 0xacb   :  { %v1224_v9 = vpop.permute.xlu1 %1223 }
 0xacc   :  { %v1245_v39 = vpop.permute.xlu0 %1244  ;;  %vm1231_vm14 = vcmp.eq.f32.partialorder %v1719_v12, %v1224_v9 }
 0xacd   :  { %v2217_v48 = vsel %vm1232_vm1, %v1245_v39, 0.0 }
 0xacf   :  { %v1252_v58 = vpop.permute.xlu1 %1251 }
 0xad0   :  { %vm1259_vm12 = vcmp.eq.f32.partialorder %v1719_v12, %v1252_v58 }
 0xad1   :  { %v843_v24 = vpop.permute.xlu0 %842 }
 0xad2   :  { %vm850_vm8 = vcmp.eq.f32.partialorder %v1719_v12, %v843_v24 }
 0xad3   :  { %v866_v1 = vsel %vm850_vm8, %v859_v44, 0.0  ;;  %v1257_v21 = vpop.permute.xlu1 %1256 }
 0xad4   :  { %v894_v38 = vadd.f32 %v892_v35, %v866_v1  ;;  %vm1260_vm11 = vcmp.eq.f32.partialorder %v1719_v12, %v1257_v21 }
 0xad5   :  { %v848_v43 = vpop.permute.xlu0 %847 }
 0xad6   :  { %v904_v16 = vmul.f32 %v899_v6, %v894_v38  ;;  %vm851_vm9 = vcmp.eq.f32.partialorder %v1719_v12, %v848_v43 }
 0xad8   :  { %v906_v33 = vsel %vm124_vm0, %v904_v16, 0.0  ;;  %v1309_v60 = vpop.permute.xlu1 %1308 }
 0xad9   :  { %907 = vadd.xlane.f32.xlu1 %v906_v33  ;;  %v876_v18 = vpop.permute.xlu0 %875  ;;  %vm1312_vm2 = vcmp.eq.f32.partialorder %v1719_v12, %v1309_v60 }
 0xada   :  { %vm879_vm10 = vcmp.eq.f32.partialorder %v1719_v12, %v876_v18 }
 0xadd   :  { %v864_v41 = vpop.permute.xlu0 %863 }
 0xade   :  { %v867_v53 = vsel %vm851_vm9, %v864_v41, 0.0 }
 0xae1   :  { %v890_v46 = vpop.permute.xlu0 %889 }
 0xae2   :  { %v893_v19 = vsel %vm879_vm10, %v890_v46, 0.0 }
 0xae3   :  { %v895_v30 = vadd.f32 %v893_v19, %v867_v53 }
 0xae5   :  { %v905_v26 = vmul.f32 %v901_v13, %v895_v30  ;;  %v1332_v13 = vpop.permute.xlu1 %1331  ;;  %v1304_v16 = vpop.permute.xlu0 %1303 }
 0xae6   :  { %vm1339_vm15 = vcmp.eq.f32.partialorder %v1719_v12, %v1332_v13  ;;  %vm1311_vm3 = vcmp.eq.f32.partialorder %v1719_v12, %v1304_v16 }
 0xae7   :  { %v909_v34 = vsel %vm124_vm0, %v905_v26, 0.0  ;;  %v1593_v26 = vpop.eup %1592 }
 0xae8   :  { %910 = vadd.xlane.f32.xlu0 %v909_v34  ;;  %v624_v15 = vmul.f32 0.6931472, %v1593_v26 }
 0xae9   :  { %v1240_v51 = vpop.permute.xlu1 %1239  ;;  %v1337_v18 = vpop.permute.xlu0 %1336 }
 0xaea   :  { %975 = vperm.xlu1 %1508, %v2161_v32   ;;  %v1247_v50 = vsel %vm1231_vm14, %v1240_v51, 0.0  ;;  %vm1340_vm5 = vcmp.eq.f32.partialorder %v1719_v12, %v1337_v18 }
 0xaed   :  { %v1266_v27 = vpop.permute.xlu1 %1265 }
 0xaee   :  { %1359 = vrot.lane.b32.xlu1 %v2144_v42, %s1656_s23  ;;  %v1273_v39 = vsel %vm1259_vm12, %v1266_v27, 0.0 }
 0xaef   :  { %1509 = vset.pattern.permute.xlu1 %v1648_v3  ;;  %v1275_v35 = vadd.f32 %v1273_v39, %v1247_v50 }
 0xaf1   :  { %v1271_v44 = vpop.permute.xlu1 %1270  ;;  %v1277_v38 = vmul.f32 %v2144_v42, %v1275_v35 }
 0xaf2   :  { %1361 = vrot.lane.b32.xlu1 %v2132_v40, %s1656_s23  ;;  %v1274_v11 = vsel %vm1260_vm11, %v1271_v44, 0.0 }
 0xaf3   :  { %v1276_v24 = vadd.f32 %v1274_v11, %v2217_v48  ;;  %v1279_v43 = vsel %vm124_vm0, %v1277_v38, 0.0  ;;  %v1320_v48 = vpop.permute.xlu0 %1319 }
 0xaf4   :  { %v1327_v34 = vsel %vm1311_vm3, %v1320_v48, 0.0  ;;  %v1070_v48 = vmul.f32 %v2247_v25, %v1719_v12 }
 0xaf5   :  { %v1278_v1 = vmul.f32 %v2132_v40, %v1276_v24  ;;  %v1325_v33 = vpop.permute.xlu1 %1324 }
 0xaf6   :  { %1118 = vrot.lane.b32.xlu1 %v1114_v45, %s1656_s23  ;;  %v1595_v45 = vpop.eup %1594 }
 0xaf7   :  { %v1282_v6 = vsel %vm124_vm0, %v1278_v1, 0.0  ;;  %v1351_v30 = vpop.permute.xlu0 %1350  ;;  %v676_v49 = vmul.f32 0.6931472, %v1595_v45  ;;  %v1597_v27 = vpop.eup %1596 }
 0xaf8   :  { %v1354_v4 = vsel %vm1340_vm5, %v1351_v30, 0.0  ;;  %v1599_v54 = vpop.eup %1598  ;;  %v674_v11 = vmul.f32 0.6931472, %v1597_v27 }
 0xaf9   :  { %v1346_v41 = vpop.permute.xlu1 %1345 }
 0xafa   :  { %1120 = vrot.lane.b32.xlu1 %v1115_v52, %s1656_s23  ;;  %v1353_v53 = vsel %vm1339_vm15, %v1346_v41, 0.0  ;;  %v1328_v52 = vsel %vm1312_vm2, %v1325_v33, 0.0  ;;  %v677_v50 = vadd.f32 %v674_v11, %v2018_v17  ;;  %v1071_v33 = vmul.f32 %v2245_v7, %v1719_v12 }
 0xafb   :  { %v1355_v47 = vadd.f32 %v1353_v53, %v1327_v34  ;;  %v1356_v55 = vadd.f32 %v1354_v4, %v1328_v52  ;;  %v1000_v4 = vand.u32 2147483647, %v2144_v42 }
 0xafc   :  { %v1075_v18 = vsel %vm124_vm0, %v1071_v33, 0.0 }
 0xafe   :  { %971 = vperm.xlu0 %1507, %v2123_v31  }
 0xb02   :  { %1510 = vset.pattern.permute.xlu0 %v1648_v3  ;;  %v1067_v3 = vsel %vm124_vm0, %v2245_v7, 0.0 }
 0xb1d   :  { %1068 = vadd.xlane.f32.xlu0 %v1067_v3 }
 0xb1e   :  { %1065 = vadd.xlane.f32.xlu1 %v1064_v29 }
 0xb21   :  { %1112 = vadd.xlane.f32.xlu0 %v1111_v22  ;;  %v626_v22 = vadd.f32 %v624_v15, %v2003_v28 }
 0xb22   :  { %1109 = vadd.xlane.f32.xlu1 %v1108_v57  ;;  %v678_v57 = vadd.f32 %v676_v49, %v2029_v63  ;;  %v622_v63 = vmul.f32 0.6931472, %v1599_v54 }
 0xb23   :  { %v825_v60 = vsub.f32 %v626_v22, %v2179_v0 }
 0xb24   :  { %v625_v24 = vadd.f32 %v622_v63, %v1974_v23  ;;  %v1633_v23 = vld [vmem:[%s2401_s1 + $0x18] sm:$0xff] }
 0xb26   :  { %v824_v38 = vsub.f32 %v625_v24, %v2137_v2 }
 0xb33   :  { %1166 = vrot.lane.b32.xlu1 %v2123_v31, %s1652_s21 }
 0xb37   :  { %1168 = vrot.lane.b32.xlu0 %v2161_v32, %s1652_s21 }
 0xb56   :  { %1283 = vadd.xlane.f32.xlu0 %v1282_v6 }
 0xb57   :  { %1280 = vadd.xlane.f32.xlu1 %v1279_v43 }
 0xb66   :  { %v908_v46 = vpop.xlane.xlu1 %907 }
 0xb67   :  { %v912_v35 = vsub.f32 %v677_v50, %v908_v46  ;;  %v1072_v46 = vsel %vm124_vm0, %v1070_v48, 0.0 }
 0xb69   :  { %v914_v6 = vadd.f32 %v912_v35, %v824_v38 }
 0xb6a   :  { %v976_v19 = vpop.permute.xlu1 %975 }
 0xb6b   :  { %vm979_vm1 = vcmp.eq.f32.partialorder %v1719_v12, %v976_v19 }
 0xb6c   :  { %v981_v39 = vsel %vm979_vm1, 1.0, %v1654_v37 }
 0xb6d   :  { %v983_v1 = vmul.f32 0.9, %v981_v39 }
 0xb6e   :  { %v1360_v20 = vpop.permute.xlu1 %1359 }
 0xb6f   :  { %v1365_v36 = vmul.f32 %v1360_v20, %v1355_v47  ;;  %v985_v43 = vadd.f32 0.00125, %v983_v1 }
 0xb71   :  { %v1367_v3 = vsel %vm124_vm0, %v1365_v36, 0.0 }
 0xb72   :  { %v1362_v29 = vpop.permute.xlu1 %1361  ;;  %1368 = vadd.xlane.f32.xlu1 %v1367_v3  ;;  %v1001_v3 = vand.u32 2147483647, %v2132_v40 }
 0xb73   :  { %v1366_v9 = vmul.f32 %v1362_v29, %v1356_v55  ;;  %v1002_v29 = vsub.f32 0.0, %v1000_v4 }
 0xb74   :  { %v1003_v27 = vsub.f32 0.0, %v1001_v3 }
 0xb75   :  { %v911_v58 = vpop.xlane.xlu0 %910  ;;  %v1370_v21 = vsel %vm124_vm0, %v1366_v9, 0.0 }
 0xb76   :  { %v913_v13 = vsub.f32 %v678_v57, %v911_v58  ;;  %1371 = vadd.xlane.f32.xlu0 %v1370_v21  ;;  %v1119_v16 = vpop.permute.xlu1 %1118 }
 0xb77   :  { %v1124_v53 = vsel %vm124_vm0, %v1119_v16, 0.0 }
 0xb78   :  { %v915_v51 = vadd.f32 %v913_v13, %v825_v60 }
 0xb7a   :  { %v917_v2 = vmul.f32 %v1633_v23, %v915_v51 }
 0xb7d   :  { %v972_v44 = vpop.permute.xlu0 %971 }
 0xb7e   :  { %vm978_vm6 = vcmp.eq.f32.partialorder %v1719_v12, %v972_v44  ;;  %v1004_v44 = vmul.f32 1.442695, %v1002_v29 }
 0xb7f   :  { %v980_v28 = vsel %vm978_vm6, 1.0, %v1654_v37  ;;  %v1632_v37 = vld [vmem:[%s2401_s1 + $0x10] sm:$0xff]  ;;  %s480_s1 = smul.f32 %s2075_s15, %s2073_s14 }
 0xb80   :  { %v982_v14 = vmul.f32 0.9, %v980_v28  ;;  %v916_v17 = vmul.f32 %v1632_v37, %v914_v6  ;;  %s122_s14 = smul.f32 %s2069_s12, %s2067_s10 }
 0xb82   :  { %v984_v0 = vadd.f32 0.00125, %v982_v14 }
 0xb83   :  { %1017 = vperm.xlu1 %1509, %v2123_v31  }
 0xb87   :  { %990 = vrot.lane.b32.xlu1 %v984_v0, %s1655_s22  ;;  %v1006_v0 = vmul.f32 1.442695, %v1003_v27 }
 0xb8b   :  { %992 = vrot.lane.b32.xlu1 %v985_v43, %s1655_s22 }
 0xb8c   :  { %1021 = vperm.xlu0 %1510, %v2161_v32  }
 0xb8f   :  { %920 = vrot.lane.b32.xlu1 %v916_v17, %s1647_s11 }
 0xb90   :  { %1511 = vset.pattern.permute.xlu0 %v1659_v62  ;;  %v1121_v62 = vpop.permute.xlu1 %1120 }
 0xb91   :  { %v1127_v41 = vsel %vm124_vm0, %v1121_v62, 0.0  ;;  %v986_v62 = vmax.f32 %v2144_v42, 0.0 }
 0xb93   :  { %922 = vrot.lane.b32.xlu1 %v917_v2, %s1647_s11 }
 0xb97   :  { %951 = vrot.lane.b32.xlu1 %v2123_v31, %s1647_s11 }
 0xb9b   :  { %953 = vrot.lane.b32.xlu1 %v2161_v32, %s1647_s11 }
 0xbaa   :  { %v2316_v19 = vpop.xlane.xlu0 %1068 }
 0xbab   :  { %1076 = vadd.xlane.f32.xlu0 %v1075_v18  ;;  %v2314_v7 = vpop.xlane.xlu1 %1065 }
 0xbac   :  { %1600 = vlog2.f32 %v2314_v7 }
 0xbae   :  { %v2320_v26 = vpop.xlane.xlu0 %1112 }
 0xbaf   :  { %1128 = vadd.xlane.f32.xlu0 %v1127_v41  ;;  %v2318_v30 = vpop.xlane.xlu1 %1109 }
 0xbb0   :  { %1602 = vlog2.f32 %v2318_v30 }
 0xbb1   :  { %1604 = vlog2.f32 %v2316_v19 }
 0xbb2   :  { %v1169_v25 = vpop.permute.xlu0 %1168  ;;  %1606 = vlog2.f32 %v2320_v26 }
 0xbb3   :  { %v1167_v34 = vpop.permute.xlu1 %1166  ;;  %v1173_v45 = vsub.f32 %v2161_v32, %v1169_v25  ;;  %1608 = vpow2.f32 %v1004_v44 }
 0xbb4   :  { %v1172_v12 = vsub.f32 %v2123_v31, %v1167_v34  ;;  %1610 = vpow2.f32 %v1006_v0 }
 0xbb6   :  { %v1601_v47 = vpop.eup %1600 }
 0xbb7   :  { %v1083_v36 = vmul.f32 0.6931472, %v1601_v47 }
 0xbb9   :  { %v1086_v22 = vadd.f32 %v1083_v36, %v2241_v8 }
 0xbba   :  { %v1603_v52 = vpop.eup %1602 }
 0xbbb   :  { %v1605_v20 = vpop.eup %1604  ;;  %v1135_v15 = vmul.f32 0.6931472, %v1603_v52 }
 0xbbc   :  { %v1607_v49 = vpop.eup %1606  ;;  %v1085_v9 = vmul.f32 0.6931472, %v1605_v20 }
 0xbbd   :  { %v1138_v57 = vadd.f32 %v1135_v15, %v2181_v56  ;;  %v1137_v58 = vmul.f32 0.6931472, %v1607_v49  ;;  %v1609_v35 = vpop.eup %1608 }
 0xbbe   :  { %v1087_v54 = vadd.f32 %v1085_v9, %v2214_v10  ;;  %v1611_v38 = vpop.eup %1610  ;;  %v1008_v6 = vadd.f32 1.0, %v1609_v35 }
 0xbbf   :  { %1073 = vadd.xlane.f32.xlu1 %v1072_v46  ;;  %v1139_v28 = vadd.f32 %v1137_v58, %v2185_v59  ;;  %v1009_v59 = vadd.f32 1.0, %v1611_v38  ;;  %v987_v46 = vmax.f32 %v2132_v40, 0.0 }
 0xbc0   :  { %1612 = vlog2.f32 %v1008_v6 }
 0xbc1   :  { %1614 = vlog2.f32 %v1009_v59 }
 0xbc2   :  { %1616 = vrcp.f32 %v2316_v19 }
 0xbc3   :  { %1125 = vadd.xlane.f32.xlu1 %v1124_v53  ;;  %1618 = vrcp.f32 %v2320_v26 }
 0xbc4   :  { %1620 = vrcp.f32 %v2314_v7 }
 0xbc5   :  { %1146 = vrot.lane.b32.xlu0 %v2161_v32, %s1649_s18  ;;  %1622 = vrcp.f32 %v2318_v30 }
 0xbca   :  { %v1613_v48 = vpop.eup %1612 }
 0xbcb   :  { %v1615_v34 = vpop.eup %1614 }
 0xbcc   :  { %v1013_v47 = vmul.f32 0.6931472, %v1615_v34  ;;  %v1617_v49 = vpop.eup %1616 }
 0xbcd   :  { %v1619_v29 = vpop.eup %1618 }
 0xbd4   :  { %1144 = vrot.lane.b32.xlu1 %v2123_v31, %s1649_s18 }
 0xbd8   :  { %1176 = vrot.lane.b32.xlu1 %v1172_v12, %s1649_s18  ;;  %v1011_v12 = vmul.f32 0.6931472, %v1613_v48 }
 0xbdc   :  { %1178 = vrot.lane.b32.xlu1 %v1173_v45, %s1649_s18 }
 0xbe3   :  { %v1284_v21 = vpop.xlane.xlu0 %1283 }
 0xbe4   :  { %v1281_v55 = vpop.xlane.xlu1 %1280  ;;  %v1286_v39 = vsub.f32 %v1087_v54, %v1284_v21 }
 0xbe5   :  { %v1285_v13 = vsub.f32 %v1086_v22, %v1281_v55 }
 0xbff   :  { %v1369_v60 = vpop.xlane.xlu1 %1368 }
 0xc00   :  { %v1373_v51 = vsub.f32 %v1138_v57, %v1369_v60 }
 0xc02   :  { %v1375_v11 = vadd.f32 %v1373_v51, %v1285_v13  ;;  %v1621_v51 = vpop.eup %1620 }
 0xc03   :  { %v1018_v14 = vpop.permute.xlu1 %1017  ;;  %v1372_v63 = vpop.xlane.xlu0 %1371 }
 0xc04   :  { %v1374_v50 = vsub.f32 %v1139_v28, %v1372_v63  ;;  %v1377_v15 = vmul.f32 %v2123_v31, %v1375_v11  ;;  %v1623_v54 = vpop.eup %1622 }
 0xc06   :  { %v1376_v8 = vadd.f32 %v1374_v50, %v1286_v39 }
 0xc07   :  { %v991_v56 = vpop.permute.xlu1 %990 }
 0xc08   :  { %v996_v41 = vmul.f32 %v2144_v42, %v991_v56 }
 0xc0a   :  { %v998_v25 = vsub.f32 %v986_v62, %v996_v41 }
 0xc0b   :  { %v993_v24 = vpop.permute.xlu1 %992  ;;  %v1022_v36 = vpop.permute.xlu0 %1021 }
 0xc0c   :  { %v997_v53 = vmul.f32 %v2132_v40, %v993_v24  ;;  %v1014_v52 = vadd.f32 %v1011_v12, %v998_v25  ;;  %v1378_v40 = vmul.f32 %v2161_v32, %v1376_v8 }
 0xc0e   :  { %v999_v45 = vsub.f32 %v987_v46, %v997_v53  ;;  %v1024_v20 = vmul.f32 %v1018_v14, %v1014_v52 }
 0xc0f   :  { %v921_v1 = vpop.permute.xlu1 %920 }
 0xc10   :  { %v926_v10 = vsel %vm27_vm4, %v921_v1, 0.0  ;;  %v1015_v4 = vadd.f32 %v1013_v47, %v999_v45 }
 0xc12   :  { %v1025_v42 = vmul.f32 %v1022_v36, %v1015_v4 }
 0xc13   :  { %v923_v43 = vpop.permute.xlu1 %922 }
 0xc14   :  { %v927_v37 = vsel %vm27_vm4, %v923_v43, 0.0 }
 0xc15   :  { %v928_v17 = vadd.f32 %v927_v37, %v926_v10 }
 0xc17   :  { %929 = vadd.xlane.f32.xlu0 %v928_v17  ;;  %v2340_v23 = vpop.permute.xlu1 %951 }
 0xc18   :  { %v957_v16 = vsel %vm27_vm4, %v2340_v23, 0.0 }
 0xc1b   :  { %v2342_v2 = vpop.permute.xlu1 %953 }
 0xc1c   :  { %v958_v33 = vsel %vm27_vm4, %v2342_v2, 0.0 }
 0xc1d   :  { %v959_v18 = vadd.f32 %v958_v33, %v957_v16 }
 0xc1f   :  { %960 = vadd.xlane.f32.xlu1 %v959_v18 }
 0xc2d   :  { %1028 = vrot.lane.b32.xlu0 %v1024_v20, %s1657_s24 }
 0xc30   :  { %1030 = vrot.lane.b32.xlu1 %v1025_v42, %s1657_s24 }
 0xc31   :  { %1381 = vrot.lane.b32.xlu0 %v1377_v15, %s1647_s11 }
 0xc34   :  { %1383 = vrot.lane.b32.xlu1 %v1378_v40, %s1647_s11 }
 0xc38   :  { %v1077_v55 = vpop.xlane.xlu0 %1076 }
 0xc39   :  { %v1081_v3 = vmul.f32 %v1617_v49, %v1077_v55 }
 0xc3b   :  { %v1141_v19 = vsub.f32 %v2161_v32, %v1081_v3 }
 0xc3c   :  { %v1129_v9 = vpop.xlane.xlu0 %1128 }
 0xc3d   :  { %v1133_v22 = vmul.f32 %v1619_v29, %v1129_v9  ;;  %v1159_v21 = vmax.f32 %v1141_v19, %v2193_v5 }
 0xc3f   :  { %v1143_v57 = vadd.f32 %v2161_v32, %v1133_v22 }
 0xc40   :  { %v1147_v58 = vpop.permute.xlu0 %1146 }
 0xc41   :  { %v1151_v60 = vmin.f32 %v1143_v57, %v1147_v58  ;;  %v1165_v13 = vsub.f32 %v1143_v57, %v1141_v19 }
 0xc43   :  { %v1161_v26 = vsub.f32 %v1151_v60, %v1159_v21 }
 0xc45   :  { %v1163_v35 = vmax.f32 %v1161_v26, 0.0 }
 0xc4c   :  { %v1074_v27 = vpop.xlane.xlu1 %1073 }
 0xc4d   :  { %v1079_v44 = vmul.f32 %v1621_v51, %v1074_v27 }
 0xc4f   :  { %v1140_v28 = vsub.f32 %v2123_v31, %v1079_v44 }
 0xc50   :  { %v1126_v11 = vpop.xlane.xlu1 %1125 }
 0xc51   :  { %v1131_v14 = vmul.f32 %v1623_v54, %v1126_v11  ;;  %v1158_v5 = vmax.f32 %v1140_v28, %v2189_v61 }
 0xc53   :  { %v1142_v32 = vadd.f32 %v2123_v31, %v1131_v14 }
 0xc54   :  { %v1145_v63 = vpop.permute.xlu1 %1144 }
 0xc55   :  { %v1150_v39 = vmin.f32 %v1142_v32, %v1145_v63  ;;  %v1164_v50 = vsub.f32 %v1142_v32, %v1140_v28 }
 0xc57   :  { %v1160_v0 = vsub.f32 %v1150_v39, %v1158_v5 }
 0xc58   :  { %v1177_v7 = vpop.permute.xlu1 %1176 }
 0xc59   :  { %v1162_v8 = vmax.f32 %v1160_v0, 0.0  ;;  %v1182_v56 = vadd.f32 %v1177_v7, %v1164_v50 }
 0xc5b   :  { %v1184_v30 = vsub.f32 %v1182_v56, %v1162_v8 }
 0xc5c   :  { %v1179_v24 = vpop.permute.xlu1 %1178 }
 0xc5d   :  { %v1186_v1 = vadd.f32 1e-07, %v1184_v30  ;;  %v1183_v38 = vadd.f32 %v1179_v24, %v1165_v13 }
 0xc5f   :  { %1624 = vrcp.f32 %v1186_v1  ;;  %v1185_v6 = vsub.f32 %v1183_v38, %v1163_v35 }
 0xc61   :  { %v1187_v43 = vadd.f32 1e-07, %v1185_v6 }
 0xc63   :  { %1626 = vrcp.f32 %v1187_v43 }
 0xc69   :  { %v1625_v10 = vpop.eup %1624 }
 0xc6a   :  { %v1189_v31 = vmul.f32 %v1625_v10, %v1162_v8 }
 0xc6c   :  { %v1192_v37 = vsub.f32 1.0, %v1189_v31 }
 0xc6d   :  { %v1627_v59 = vpop.eup %1626 }
 0xc6e   :  { %v1191_v61 = vmul.f32 %v1627_v59, %v1163_v35  ;;  %v1194_v16 = vmul.f32 %v1192_v37, %v2340_v23 }
 0xc70   :  { %v1193_v17 = vsub.f32 1.0, %v1191_v61  ;;  %v1196_v18 = vsel %vm27_vm4, %v1194_v16, 0.0 }
 0xc72   :  { %v1195_v33 = vmul.f32 %v1193_v17, %v2342_v2 }
 0xc74   :  { %v1197_v62 = vsel %vm27_vm4, %v1195_v33, 0.0 }
 0xc75   :  { %v1198_v41 = vadd.f32 %v1197_v62, %v1196_v18 }
 0xc77   :  { %1199 = vadd.xlane.f32.xlu1 %v1198_v41 }
 0xca4   :  { %v930_v48 = vpop.xlane.xlu0 %929 }
 0xca5   :  { %v931_v46 = vrot.slane %v930_v48, 4 }
 0xca7   :  { %v932_v53 = vadd.f32 %v931_v46, %v930_v48 }
 0xca8   :  { %v1029_v25 = vpop.permute.xlu0 %1028 }
 0xca9   :  { %v933_v34 = vrot.slane %v932_v53, 2  ;;  %v1034_v2 = vsel %vm105_vm13, %v1029_v25, 0.0 }
 0xcab   :  { %v934_v12 = vadd.f32 %v933_v34, %v932_v53 }
 0xcac   :  { %v961_v45 = vpop.xlane.xlu1 %960  ;;  %v1382_v15 = vpop.permute.xlu0 %1381 }
 0xcad   :  { %v962_v47 = vrot.slane %v961_v45, 4  ;;  %v935_v52 = vrot.slane %v934_v12, 1  ;;  %v1387_v3 = vsel %vm27_vm4, %v1382_v15, 0.0 }
 0xcaf   :  { %v963_v4 = vadd.f32 %v962_v47, %v961_v45  ;;  %v936_v20 = vadd.f32 %v935_v52, %v934_v12 }
 0xcb0   :  { %v1031_v23 = vpop.permute.xlu1 %1030 }
 0xcb1   :  { %v964_v36 = vrot.slane %v963_v4, 2  ;;  %v1035_v42 = vsel %vm105_vm13, %v1031_v23, 0.0  ;;  %1460 = vpush %v936_v20 }
 0xcb2   :  { %v1036_v40 = vadd.f32 %v1035_v42, %v1034_v2 }
 0xcb3   :  { %v965_v49 = vadd.f32 %v964_v36, %v963_v4 }
 0xcb4   :  { %v1384_v55 = vpop.permute.xlu1 %1383  ;;  %1037 = vadd.xlane.f32.xlu0 %v1036_v40 }
 0xcb5   :  { %v1388_v29 = vsel %vm27_vm4, %v1384_v55, 0.0  ;;  %v966_v9 = vrot.slane %v965_v49, 1 }
 0xcb6   :  { %v1389_v19 = vadd.f32 %v1388_v29, %v1387_v3 }
 0xcb7   :  { %v967_v22 = vadd.f32 %v966_v9, %v965_v49 }
 0xcb8   :  { %1390 = vadd.xlane.f32.xlu0 %v1389_v19 }
 0xcb9   :  { %1462 = vpush %v967_v22 }
 0xce2   :  { %s1461_s11 = spop %1460 }
 0xce3   :  { %s941_s18 = smul.f32 %s1461_s11, %s2165_s16 }
 0xce5   :  { %s2379_s22 = sadd.f32 %s941_s18, %s480_s1 }
 0xcea   :  { %s1463_s24 = spop %1462 }
 0xceb   :  { %s969_s13 = smax.f32 %s1660_s3, %s1463_s24  ;;  %s589_s3 = smul.f32 %s2154_s6, %s2152_s5 }
 0xcec   :  { %s1046_s26 = smul.f32 80.0, %s969_s13  ;;  %v1208_v27 = vstv %s969_s13 }
 0xced   :  { %s590_s27 = sadd.f32 %s589_s3, %s122_s14 }
 0xcee   :  { %v1047_v60 = vstv %s1046_s26 }
 0xcef   :  { %1628 = vrcp.f32 %v1047_v60 }
 0xcf0   :  { %1630 = vrcp.f32 %v1208_v27 }
 0xcf9   :  { %v1629_v8 = vpop.eup %1628 }
 0xcfa   :  { %v1631_v24 = vpop.eup %1630 }
 0xd04   :  { %v1200_v57 = vpop.xlane.xlu1 %1199 }
 0xd05   :  { %v1201_v58 = vrot.slane %v1200_v57, 4 }
 0xd07   :  { %v1202_v21 = vadd.f32 %v1201_v58, %v1200_v57 }
 0xd09   :  { %v1203_v26 = vrot.slane %v1202_v21, 2 }
 0xd0b   :  { %v1204_v11 = vadd.f32 %v1203_v26, %v1202_v21 }
 0xd0d   :  { %v1205_v50 = vrot.slane %v1204_v11, 1 }
 0xd0f   :  { %v1206_v56 = vadd.f32 %v1205_v50, %v1204_v11 }
 0xd41   :  { %v1038_v13 = vpop.xlane.xlu0 %1037 }
 0xd42   :  { %v1039_v51 = vrot.slane %v1038_v13, 4 }
 0xd44   :  { %v1040_v44 = vadd.f32 %v1039_v51, %v1038_v13 }
 0xd45   :  { %v1391_v54 = vpop.xlane.xlu0 %1390 }
 0xd46   :  { %v1041_v28 = vrot.slane %v1040_v44, 2  ;;  %v1392_v14 = vrot.slane %v1391_v54, 4 }
 0xd48   :  { %v1393_v32 = vadd.f32 %v1392_v14, %v1391_v54  ;;  %v1042_v63 = vadd.f32 %v1041_v28, %v1040_v44 }
 0xd4a   :  { %v1394_v5 = vrot.slane %v1393_v32, 2  ;;  %v1043_v39 = vrot.slane %v1042_v63, 1 }
 0xd4c   :  { %v1395_v0 = vadd.f32 %v1394_v5, %v1393_v32  ;;  %v1044_v7 = vadd.f32 %v1043_v39, %v1042_v63 }
 0xd4e   :  { %1464 = vpush %v1044_v7  ;;  %v1396_v30 = vrot.slane %v1395_v0, 1 }
 0xd4f   :  { %1466 = vpush %v1629_v8 }
 0xd50   :  { %1468 = vpush %v1206_v56  ;;  %v1397_v35 = vadd.f32 %v1396_v30, %v1395_v0 }
 0xd51   :  { %1470 = vpush %v1631_v24 }
 0xd52   :  { %1472 = vpush %v1397_v35 }
 0xd7f   :  { %s1465_s15 = spop %1464 }
 0xd80   :  { %s1467_s28 = spop %1466 }
 0xd81   :  { %s1050_s29 = smul.f32 %s1467_s28, %s1465_s15  ;;  %s1469_s30 = spop %1468 }
 0xd82   :  { %s1471_s4 = spop %1470 }
 0xd83   :  { %s1051_s0 = sadd.f32 %s1050_s29, %s590_s27  ;;  %s1211_s7 = smul.f32 %s1471_s4, %s1469_s30 }
 0xd84   :  { %s1473_s8 = spop %1472 }
 0xd85   :  { %1407 = sst [smem:[#allocation2 + $0x1]] %s1051_s0  ;;  %s1411_s9 = smul.f32 0.5, %s1051_s0 }
 0xd86   :  { %s1212_s16 = sadd.f32 %s1211_s7, %s2170_s20  ;;  %s1402_s17 = smul.f32 %s1473_s8, %s1471_s4 }
 0xd88   :  { %1405 = sst [smem:[#allocation2]] %s1212_s16  ;;  %s1410_s19 = smul.f32 7.5, %s1212_s16 }
 0xd89   :  { %s1403_s21 = sadd.f32 %s1402_s17, %s2379_s22 }
 0xd8a   :  { %s1412_s23 = sadd.f32 %s1411_s9, %s1410_s19 }
 0xd8b   :  { %1409 = sst [smem:[#allocation2 + $0x2]] %s1403_s21  ;;  %s1413_s10 = smul.f32 1.5, %s1403_s21 }
 0xd8d   :  { %s1414_s12 = sadd.f32 %s1413_s10, %s1412_s23 }
 0xd8f   :  { %1416 = sst [smem:[#allocation2 + $0x3]] %s1414_s12 }
 0xd90   :  { %1643 = shalt.err (!%p1640_p2)
}
 0xd91   :  { %s1661_s20 = smov [#allocation2]  }
 0xd92   :  { %1424 = dma.smem_to_hbm %s1661_s20, 16, %s2402_s2, [#allocation3]  }
 0xd93   :  { %1644 = dma.done.wait [#allocation3], 16  }
 0xd94   :  { %1645 = vsyncadd [#allocation3], 4294967280 }
 0xd95   :  { %1428 = sfence }
 0xd96   :  { %1429 = vsyncpa [#allocation3], 1 }

</bundles_post_ra>
